<compile_context>
chip_gen: v7x
topology: tpu7x:2x2x1
jax: 0.10.0
libtpu: 0.0.40
codegen_flags: <defaults>
</compile_context>

<pallas_src>
import functools

import jax
import jax.numpy as jnp
from jax import lax
from jax.experimental import pallas as pl
from jax.experimental.pallas import tpu as pltpu

_LANE = 128


def _round_up(x: int, m: int) -> int:
    return ((x + m - 1) // m) * m


def _adapt_loss_kernel(inv_ref, x_ref, o_ref, *, n: int, t: int):
    """Grid step (i, j) processes the (t, t) tile at block (i, j).

    o_ref is the (1,1) per-row-block partial sum (resident across the j axis).
    """
    i = pl.program_id(0)
    j = pl.program_id(1)

    # Initialize this row-block's resident accumulator at the start of its
    # column sweep (j is the innermost / reduction axis).
    @pl.when(j == 0)
    def _init():
        o_ref[...] = jnp.zeros_like(o_ref)

    inv = inv_ref[0]                      # 1 / logit_scale, f32 scalar (SMEM)
    x = x_ref[...].astype(jnp.float32)    # stream native dtype, accumulate f32

    # Full-tile negative-pair energy: 0.5 * inv^2 * sum(x^2).
    # (The diagonal's share is removed below, only on diagonal tiles.)
    tile_sq = jnp.sum(x * x)
    o_ref[...] = o_ref[...] + 0.5 * inv * inv * tile_sq

    # Diagonal correction: only tiles on the block diagonal contain diagonal
    # elements (square tiles), so all mask/iota/select work is gated here.
    @pl.when(i == j)
    def _diag_correction():
        rows = lax.broadcasted_iota(jnp.int32, (t, t), 0)
        cols = lax.broadcasted_iota(jnp.int32, (t, t), 1)
        valid = (i * t + rows) < n                 # exclude zero-padded rows
        is_diag = (rows == cols) & valid

        d = jnp.where(is_diag, x, 0.0)
        diag_sq = jnp.sum(d * d)                   # remove from neg-pair term

        derr = jnp.where(is_diag, x * inv - 1.0, 0.0)
        diag_mse = jnp.sum(derr * derr) / float(n)  # mean over the N diag elems

        o_ref[...] = o_ref[...] + (diag_mse - 0.5 * inv * inv * diag_sq)


def _choose_tiling(n: int, itemsize: int, single_tile_budget: int):
    """Pick (n_pad, tile) for an HBM-bandwidth-bound pass over an (n, n) matrix."""
    n_pad = _round_up(max(n, _LANE), _LANE)
    # Single-tile fast path: whole padded matrix as one block (one grid step).
    if 2 * n_pad * n_pad * itemsize <= single_tile_budget:
        return n_pad, n_pad
    # Multi-tile path: pad to a multiple of 512 so we can use big tiles
    # (small extra zero-read beats hundreds of 128-tile grid steps).
    n_pad = _round_up(n, 512)
    t = 1024 if n_pad % 1024 == 0 else 512
    return n_pad, t


def adapt_loss(logits_per_image: jax.Array, logit_scale, *, tile: int | None = None,
               single_tile_budget: int = 16 * 1024 * 1024):
    """Pallas implementation of AdaptLoss.forward. Returns a scalar f32.

    `logit_scale` may be a traced (learnable) scalar; it is passed to the
    kernel through SMEM, not baked in as a compile-time constant.
    `tile` optionally forces a square tile size (multiple of 128) — used to
    exercise the multi-tile path on small inputs.
    """
    n = logits_per_image.shape[0]
    assert logits_per_image.shape == (n, n), "logits_per_image must be square"
    itemsize = jnp.dtype(logits_per_image.dtype).itemsize

    if tile is None:
        n_pad, t = _choose_tiling(n, itemsize, single_tile_budget)
    else:
        assert tile % _LANE == 0, "tile must be a multiple of 128"
        t = tile
        n_pad = _round_up(max(n, t), t)

    x = logits_per_image
    if n_pad != n:
        x = jnp.pad(x, ((0, n_pad - n), (0, n_pad - n)))  # zeros: no effect

    g = n_pad // t
    inv_scale = (1.0 / jnp.asarray(logit_scale, jnp.float32)).reshape(1)
    kernel = functools.partial(_adapt_loss_kernel, n=n, t=t)

    cost = pl.CostEstimate(
        flops=3 * n_pad * n_pad,
        transcendentals=0,
        bytes_accessed=n_pad * n_pad * itemsize + 4 * g + 4,
    )

    partials = pl.pallas_call(
        kernel,
        out_shape=jax.ShapeDtypeStruct((g, 1), jnp.float32),
        grid=(g, g),
        in_specs=[
            pl.BlockSpec(memory_space=pltpu.MemorySpace.SMEM),   # 1/scale
            pl.BlockSpec((t, t), lambda i, j: (i, j)),           # logits tile
        ],
        # One (1,1) partial sum per row block -> row axis can be megacore-parallel.
        out_specs=pl.BlockSpec((1, 1), lambda i, j: (i, 0)),
        compiler_params=pltpu.CompilerParams(
            dimension_semantics=("parallel", "arbitrary"),
            vmem_limit_bytes=32 * 1024 * 1024,
        ),
        cost_estimate=cost,
    )(inv_scale, x)

    # Tiny final reduce over the per-row-block partial sums.
    return jnp.sum(partials)


def adapt_loss_ref(logits_per_image: jax.Array, logit_scale: float) -> jax.Array:
    """Pure-JAX reference mirroring the PyTorch forward exactly."""
    n = logits_per_image.shape[0]
    x = logits_per_image.astype(jnp.float32)
    pos = jnp.diag(x) / logit_scale
    loss = jnp.mean((pos - 1.0) ** 2)
    neg = x * (1.0 - jnp.eye(n, dtype=jnp.float32)) / logit_scale
    loss = loss + 0.5 * jnp.sum(jnp.square(neg))
    return loss


if __name__ == "__main__":
    # TODO(synk): the PyTorch forward's `device` argument is a CUDA-placement
    # detail with no JAX/Pallas equivalent; it is intentionally dropped.
    logit_scale = 100.0
    loss_fn = jax.jit(adapt_loss, static_argnames=("tile",))

    # Test 1: f32 logits, N=300 (not lane-aligned) -> single-tile fast path
    # (pads to 384, one grid step), exercises padded-row masking.
    N = 300
    key = jax.random.PRNGKey(0)
    logits = jax.random.normal(key, (N, N), dtype=jnp.float32) * logit_scale

    loss = jax.block_until_ready(loss_fn(logits, jnp.float32(logit_scale)))
    ref = adapt_loss_ref(logits, logit_scale)
    assert jnp.allclose(loss, ref, rtol=1e-4, atol=1e-3), (loss, ref)

    # Test 2: bf16 logits streamed in native dtype (half the HBM bytes),
    # f32 accumulation inside the kernel.
    N2 = 256
    logits_bf16 = (
        jax.random.normal(jax.random.PRNGKey(1), (N2, N2), dtype=jnp.float32)
        * logit_scale
    ).astype(jnp.bfloat16)
    loss2 = jax.block_until_ready(loss_fn(logits_bf16, jnp.float32(logit_scale)))
    ref2 = adapt_loss_ref(logits_bf16, logit_scale)
    assert jnp.allclose(loss2, ref2, rtol=1e-3, atol=1e-3), (loss2, ref2)

    # Test 3: force the multi-tile path on a small input (tile=128 -> pads to
    # 384, 3x3 grid): exercises per-row-block partial accumulation, diagonal
    # tile gating, padded-row masking and the final partial-sum reduce.
    loss3 = jax.block_until_ready(loss_fn(logits, jnp.float32(logit_scale), tile=128))
    assert jnp.allclose(loss3, ref, rtol=1e-4, atol=1e-3), (loss3, ref)

    print("KERNEL_OK")
</pallas_src>

<mosaic_0001>
module attributes {stable_mosaic.version = 11 : i64} {
  func.func @_adapt_loss_kernel(%arg0: i32, %arg1: i32, %arg2: memref<1xf32, #tpu.memory_space<smem>>, %arg3: memref<384x384xf32, #tpu.memory_space<vmem>>, %arg4: memref<1x1xf32, #tpu.memory_space<vmem>>) attributes {dimension_semantics = [#tpu.dimension_semantics<parallel>, #tpu.dimension_semantics<arbitrary>], iteration_bounds = array<i64: 1, 1>, scalar_prefetch = 0 : i64, scratch_operands = 0 : i64, tpu.core_type = #tpu.core_type<tc>, window_params = [{transform_indices = @transform_0, window_bounds = array<i64: 1>}, {transform_indices = @transform_1, window_bounds = array<i64: 384, 384>}, {transform_indices = @transform_2, window_bounds = array<i64: 1, 1>}]} {
    %c0_i32 = arith.constant 0 : i32
    %0 = arith.cmpi eq, %arg1, %c0_i32 : i32
    %1 = arith.extui %0 : i1 to i32
    %c0_i32_0 = arith.constant 0 : i32
    %2 = arith.cmpi ne, %1, %c0_i32_0 : i32
    scf.if %2 {
      %cst_9 = arith.constant 0.000000e+00 : f32
      %20 = vector.broadcast %cst_9 : f32 to vector<1x1xf32>
      %c0_10 = arith.constant 0 : index
      %c0_11 = arith.constant 0 : index
      %21 = vector.load %arg4[%c0_10, %c0_11] : memref<1x1xf32, #tpu.memory_space<vmem>>, vector<1x1xf32>
      tpu.vector_store %arg4[%c0_10, %c0_11], %20 {strides = array<i32>} : memref<1x1xf32, #tpu.memory_space<vmem>>, vector<1x1xf32>,
    } else {
    }
    %c0 = arith.constant 0 : index
    %3 = memref.load %arg2[%c0] : memref<1xf32, #tpu.memory_space<smem>>
    %c0_1 = arith.constant 0 : index
    %c0_2 = arith.constant 0 : index
    %4 = vector.load %arg3[%c0_1, %c0_2] : memref<384x384xf32, #tpu.memory_space<vmem>>, vector<384x384xf32>
    %5 = arith.mulf %4, %4 : vector<384x384xf32>
    %6 = vector.shape_cast %5 : vector<384x384xf32> to vector<1x384x384xf32>
    %cst = arith.constant dense<0.000000e+00> : vector<1xf32>
    %7 = vector.multi_reduction <add>, %6, %cst [1, 2] : vector<1x384x384xf32> to vector<1xf32>
    %8 = vector.shape_cast %7 : vector<1xf32> to vector<1x1x1xf32>
    %9 = vector.extract %8[0, 0, 0] : f32 from vector<1x1x1xf32>
    %c0_3 = arith.constant 0 : index
    %c0_4 = arith.constant 0 : index
    %10 = vector.load %arg4[%c0_3, %c0_4] : memref<1x1xf32, #tpu.memory_space<vmem>>, vector<1x1xf32>
    %cst_5 = arith.constant 5.000000e-01 : f32
    %11 = arith.mulf %cst_5, %3 : f32
    %12 = arith.mulf %11, %3 : f32
    %13 = arith.mulf %12, %9 : f32
    %14 = vector.broadcast %13 : f32 to vector<1x1xf32>
    %15 = arith.addf %10, %14 : vector<1x1xf32>
    %c0_6 = arith.constant 0 : index
    %c0_7 = arith.constant 0 : index
    %16 = vector.load %arg4[%c0_6, %c0_7] : memref<1x1xf32, #tpu.memory_space<vmem>>, vector<1x1xf32>
    tpu.vector_store %arg4[%c0_6, %c0_7], %15 {strides = array<i32>} : memref<1x1xf32, #tpu.memory_space<vmem>>, vector<1x1xf32>,
    %17 = arith.cmpi eq, %arg0, %arg1 : i32
    %18 = arith.extui %17 : i1 to i32
    %c0_i32_8 = arith.constant 0 : i32
    %19 = arith.cmpi ne, %18, %c0_i32_8 : i32
    scf.if %19 {
      %20 = tpu.iota {dimensions = array<i32: 0>} : vector<384x384xi32>
      %21 = tpu.iota {dimensions = array<i32: 1>} : vector<384x384xi32>
      %c384_i32 = arith.constant 384 : i32
      %22 = arith.muli %arg0, %c384_i32 : i32
      %23 = vector.broadcast %22 : i32 to vector<384x384xi32>
      %24 = arith.addi %23, %20 : vector<384x384xi32>
      %c300_i32 = arith.constant 300 : i32
      %25 = vector.broadcast %c300_i32 : i32 to vector<384x384xi32>
      %26 = arith.cmpi slt, %24, %25 : vector<384x384xi32>
      %27 = arith.cmpi eq, %20, %21 : vector<384x384xi32>
      %28 = arith.andi %27, %26 : vector<384x384xi1>
      %cst_9 = arith.constant 0.000000e+00 : f32
      %29 = vector.broadcast %cst_9 : f32 to vector<384x384xf32>
      %30 = arith.select %28, %4, %29 : vector<384x384xi1>, vector<384x384xf32>
      %31 = arith.mulf %30, %30 : vector<384x384xf32>
      %32 = vector.shape_cast %31 : vector<384x384xf32> to vector<1x384x384xf32>
      %cst_10 = arith.constant dense<0.000000e+00> : vector<1xf32>
      %33 = vector.multi_reduction <add>, %32, %cst_10 [1, 2] : vector<1x384x384xf32> to vector<1xf32>
      %34 = vector.shape_cast %33 : vector<1xf32> to vector<1x1x1xf32>
      %35 = vector.extract %34[0, 0, 0] : f32 from vector<1x1x1xf32>
      %36 = vector.broadcast %3 : f32 to vector<384x384xf32>
      %37 = arith.mulf %4, %36 : vector<384x384xf32>
      %cst_11 = arith.constant 1.000000e+00 : f32
      %38 = vector.broadcast %cst_11 : f32 to vector<384x384xf32>
      %39 = arith.subf %37, %38 : vector<384x384xf32>
      %cst_12 = arith.constant 0.000000e+00 : f32
      %40 = vector.broadcast %cst_12 : f32 to vector<384x384xf32>
      %41 = arith.select %28, %39, %40 : vector<384x384xi1>, vector<384x384xf32>
      %42 = arith.mulf %41, %41 : vector<384x384xf32>
      %43 = vector.shape_cast %42 : vector<384x384xf32> to vector<1x384x384xf32>
      %cst_13 = arith.constant dense<0.000000e+00> : vector<1xf32>
      %44 = vector.multi_reduction <add>, %43, %cst_13 [1, 2] : vector<1x384x384xf32> to vector<1xf32>
      %45 = vector.shape_cast %44 : vector<1xf32> to vector<1x1x1xf32>
      %46 = vector.extract %45[0, 0, 0] : f32 from vector<1x1x1xf32>
      %cst_14 = arith.constant 3.000000e+02 : f32
      %47 = arith.divf %46, %cst_14 : f32
      %c0_15 = arith.constant 0 : index
      %c0_16 = arith.constant 0 : index
      %48 = vector.load %arg4[%c0_15, %c0_16] : memref<1x1xf32, #tpu.memory_space<vmem>>, vector<1x1xf32>
      %cst_17 = arith.constant 5.000000e-01 : f32
      %49 = arith.mulf %cst_17, %3 : f32
      %50 = arith.mulf %49, %3 : f32
      %51 = arith.mulf %50, %35 : f32
      %52 = arith.subf %47, %51 : f32
      %53 = vector.broadcast %52 : f32 to vector<1x1xf32>
      %54 = arith.addf %48, %53 : vector<1x1xf32>
      %c0_18 = arith.constant 0 : index
      %c0_19 = arith.constant 0 : index
      %55 = vector.load %arg4[%c0_18, %c0_19] : memref<1x1xf32, #tpu.memory_space<vmem>>, vector<1x1xf32>
      tpu.vector_store %arg4[%c0_18, %c0_19], %54 {strides = array<i32>} : memref<1x1xf32, #tpu.memory_space<vmem>>, vector<1x1xf32>,
    } else {
    }
    return
  }
  func.func @transform_0(%arg0: i32, %arg1: i32) -> i32 {
    %c0_i32 = arith.constant 0 : i32
    %c0_i32_0 = arith.constant 0 : i32
    return %c0_i32 : i32
  }
  func.func @transform_1(%arg0: i32, %arg1: i32) -> (i32, i32) {
    %c0_i32 = arith.constant 0 : i32
    return %arg0, %arg1 : i32, i32
  }
  func.func @transform_2(%arg0: i32, %arg1: i32) -> (i32, i32) {
    %c0_i32 = arith.constant 0 : i32
    %c0_i32_0 = arith.constant 0 : i32
    return %arg0, %c0_i32 : i32, i32
  }
}

</mosaic_0001>

<bundles_post_ra>
// kernel: adapt_loss.1
= control target key start
LH: loop header
LB: loop body
LE: loop exit
PB: predicated region body
PF: predicated region fallthrough
CT: control target
= control target key end

     0   :  { %s3588_s0 = inlined_call_operand.<no memory space> [shape: f32[1], index: 0, kind: input, shape index: {}]   ;;  %s3589_s1 = inlined_call_operand.vmem [shape: f32[384,384], index: 1, kind: input, shape index: {}]   ;;  %s3590_s2 = inlined_call_operand.hbm [shape: f32[1,1], index: 2, kind: output, shape index: {}]  }
   0x1   :  { %v2310_v0 = vld [vmem:[%s3589_s1] sm:$0xff]  ;;  %v21_v1 = vld [vmem:[%s3589_s1 + $0x8] sm:$0xff]  ;;  %v22_v2 = vld [vmem:[%s3589_s1 + $0x10] sm:$0xff] }
   0x2   :  { %v2321_v3 = vld [vmem:[%s3589_s1 + $0x18] sm:$0xff]  ;;  %v164_v4 = vmul.f32 %v2310_v0, %v2310_v0  ;;  %v165_v5 = vmul.f32 %v21_v1, %v21_v1  ;;  %v166_v6 = vmul.f32 %v22_v2, %v22_v2  ;;  %v24_v7 = vld [vmem:[%s3589_s1 + $0x20] sm:$0xff]  ;;  %v25_v10 = vld [vmem:[%s3589_s1 + $0x28] sm:$0xff] }
   0x3   :  { %v167_v8 = vmul.f32 %v2321_v3, %v2321_v3  ;;  %v168_v11 = vmul.f32 %v24_v7, %v24_v7  ;;  %v2336_v13 = vld [vmem:[%s3589_s1 + $0x30] sm:$0xff]  ;;  %v169_v14 = vmul.f32 %v25_v10, %v25_v10  ;;  %v27_v16 = vld [vmem:[%s3589_s1 + $0x38] sm:$0xff]  ;;  %v28_v19 = vld [vmem:[%s3589_s1 + $0x40] sm:$0xff] }
   0x4   :  { %v308_v9 = vadd.f32 %v165_v5, %v164_v4  ;;  %v170_v17 = vmul.f32 %v2336_v13, %v2336_v13  ;;  %v171_v20 = vmul.f32 %v27_v16, %v27_v16  ;;  %v2349_v22 = vld [vmem:[%s3589_s1 + $0x48] sm:$0xff]  ;;  %v172_v23 = vmul.f32 %v28_v19, %v28_v19  ;;  %v30_v25 = vld [vmem:[%s3589_s1 + $0x50] sm:$0xff]  ;;  %v31_v28 = vld [vmem:[%s3589_s1 + $0x58] sm:$0xff] }
   0x5   :  { %v173_v26 = vmul.f32 %v2349_v22, %v2349_v22  ;;  %v174_v29 = vmul.f32 %v30_v25, %v30_v25  ;;  %v2362_v31 = vld [vmem:[%s3589_s1 + $0x60] sm:$0xff]  ;;  %v175_v32 = vmul.f32 %v31_v28, %v31_v28  ;;  %v33_v34 = vld [vmem:[%s3589_s1 + $0x68] sm:$0xff]  ;;  %v34_v37 = vld [vmem:[%s3589_s1 + $0x70] sm:$0xff] }
   0x6   :  { %v309_v12 = vadd.f32 %v308_v9, %v166_v6  ;;  %v176_v35 = vmul.f32 %v2362_v31, %v2362_v31  ;;  %v177_v38 = vmul.f32 %v33_v34, %v33_v34  ;;  %v2375_v40 = vld [vmem:[%s3589_s1 + $0x78] sm:$0xff]  ;;  %v178_v41 = vmul.f32 %v34_v37, %v34_v37  ;;  %v36_v43 = vld [vmem:[%s3589_s1 + $0x80] sm:$0xff]  ;;  %v37_v46 = vld [vmem:[%s3589_s1 + $0x88] sm:$0xff] }
   0x7   :  { %v179_v44 = vmul.f32 %v2375_v40, %v2375_v40  ;;  %v180_v47 = vmul.f32 %v36_v43, %v36_v43  ;;  %v2388_v49 = vld [vmem:[%s3589_s1 + $0x90] sm:$0xff]  ;;  %v181_v50 = vmul.f32 %v37_v46, %v37_v46  ;;  %v39_v52 = vld [vmem:[%s3589_s1 + $0x98] sm:$0xff]  ;;  %v40_v55 = vld [vmem:[%s3589_s1 + $0xa0] sm:$0xff] }
   0x8   :  { %v310_v15 = vadd.f32 %v309_v12, %v167_v8  ;;  %v182_v53 = vmul.f32 %v2388_v49, %v2388_v49  ;;  %v183_v56 = vmul.f32 %v39_v52, %v39_v52  ;;  %v2401_v58 = vld [vmem:[%s3589_s1 + $0xa8] sm:$0xff]  ;;  %v184_v59 = vmul.f32 %v40_v55, %v40_v55  ;;  %v42_v61 = vld [vmem:[%s3589_s1 + $0xb0] sm:$0xff]  ;;  %v43_v1 = vld [vmem:[%s3589_s1 + $0xb8] sm:$0xff] }
   0x9   :  { %v185_v62 = vmul.f32 %v2401_v58, %v2401_v58  ;;  %v186_v2 = vmul.f32 %v42_v61, %v42_v61  ;;  %v2414_v5 = vld [vmem:[%s3589_s1 + $0xc0] sm:$0xff]  ;;  %v187_v6 = vmul.f32 %v43_v1, %v43_v1  ;;  %v45_v8 = vld [vmem:[%s3589_s1 + $0xc8] sm:$0xff] }
   0xa   :  { %v311_v18 = vadd.f32 %v310_v15, %v168_v11  ;;  %v188_v9 = vmul.f32 %v2414_v5, %v2414_v5  ;;  %v46_v11 = vld [vmem:[%s3589_s1 + $0xd0] sm:$0xff]  ;;  %v189_v12 = vmul.f32 %v45_v8, %v45_v8  ;;  %v2427_v15 = vld [vmem:[%s3589_s1 + $0xd8] sm:$0xff] }
   0xc   :  { %v312_v21 = vadd.f32 %v311_v18, %v169_v14 }
   0xe   :  { %v313_v24 = vadd.f32 %v312_v21, %v170_v17 }
  0x10   :  { %v314_v27 = vadd.f32 %v313_v24, %v171_v20 }
  0x12   :  { %v315_v30 = vadd.f32 %v314_v27, %v172_v23 }
  0x14   :  { %v316_v33 = vadd.f32 %v315_v30, %v173_v26 }
  0x16   :  { %v317_v36 = vadd.f32 %v316_v33, %v174_v29 }
  0x18   :  { %v318_v39 = vadd.f32 %v317_v36, %v175_v32 }
  0x1a   :  { %v319_v42 = vadd.f32 %v318_v39, %v176_v35 }
  0x1c   :  { %v320_v45 = vadd.f32 %v319_v42, %v177_v38 }
  0x1e   :  { %v321_v48 = vadd.f32 %v320_v45, %v178_v41 }
  0x20   :  { %v322_v51 = vadd.f32 %v321_v48, %v179_v44 }
  0x22   :  { %v323_v54 = vadd.f32 %v322_v51, %v180_v47 }
  0x24   :  { %v324_v57 = vadd.f32 %v323_v54, %v181_v50 }
  0x26   :  { %v325_v60 = vadd.f32 %v324_v57, %v182_v53 }
  0x28   :  { %v326_v63 = vadd.f32 %v325_v60, %v183_v56 }
  0x2a   :  { %v327_v4 = vadd.f32 %v326_v63, %v184_v59 }
  0x2c   :  { %v328_v7 = vadd.f32 %v327_v4, %v185_v62 }
  0x2e   :  { %v329_v10 = vadd.f32 %v328_v7, %v186_v2 }
  0x30   :  { %v330_v14 = vadd.f32 %v329_v10, %v187_v6 }
  0x31   :  { %8 = vsyncpa [#allocation4], 0  ;;  %v190_v16 = vmul.f32 %v46_v11, %v46_v11  ;;  %v48_v18 = vld [vmem:[%s3589_s1 + $0xe0] sm:$0xff]  ;;  %v191_v19 = vmul.f32 %v2427_v15, %v2427_v15  ;;  %v49_v21 = vld [vmem:[%s3589_s1 + $0xe8] sm:$0xff]  ;;  %s461_s14 = smul.f32 0.5, %s3588_s0  ;;  %s2291_s25 = smov [#allocation3]  }
  0x32   :  { %v331_v17 = vadd.f32 %v330_v14, %v188_v9  ;;  %v192_v23 = vmul.f32 %v48_v18, %v48_v18  ;;  %v2440_v25 = vld [vmem:[%s3589_s1 + $0xf0] sm:$0xff]  ;;  %v193_v26 = vmul.f32 %v49_v21, %v49_v21  ;;  %v51_v28 = vld [vmem:[%s3589_s1 + $0xf8] sm:$0xff]  ;;  %v52_v32 = vld [vmem:[%s3589_s1 + $0x100] sm:$0xff]  ;;  %s2095_s26 = sshll.u32 %s2291_s25, 4  ;;  %s2096_s26 = int_to_ptr.vmem [resolvable:$true] %s2095_s26 }
  0x33   :  { %v194_v29 = vmul.f32 %v2440_v25, %v2440_v25  ;;  %v195_v33 = vmul.f32 %v51_v28, %v51_v28  ;;  %v2453_v35 = vld [vmem:[%s3589_s1 + $0x108] sm:$0xff]  ;;  %v196_v36 = vmul.f32 %v52_v32, %v52_v32  ;;  %v54_v38 = vld [vmem:[%s3589_s1 + $0x110] sm:$0xff]  ;;  %v55_v42 = vld [vmem:[%s3589_s1 + $0x118] sm:$0xff]  ;;  %s462_s17 = smul.f32 %s461_s14, %s3588_s0  ;;  %s2270_s27 = scalar_lea.vmem %s2096_s26, 32 }
  0x34   :  { %v332_v20 = vadd.f32 %v331_v17, %v189_v12  ;;  %v197_v39 = vmul.f32 %v2453_v35, %v2453_v35  ;;  %v198_v43 = vmul.f32 %v54_v38, %v54_v38  ;;  %v2466_v45 = vld [vmem:[%s3589_s1 + $0x120] sm:$0xff]  ;;  %v57_v46 = vld [vmem:[%s3589_s1 + $0x128] sm:$0xff]  ;;  %v58_v47 = vld [vmem:[%s3589_s1 + $0x130] sm:$0xff]  ;;  %v199_v52 = vmul.f32 %v55_v42, %v55_v42  ;;  %p2271_p1 = scmp.lt.s32.totalorder %s2096_s26, %s2096_s26 }
  0x35   :  { %v2477_v48 = vld [vmem:[%s3589_s1 + $0x138] sm:$0xff]  ;;  %v60_v50 = vld [vmem:[%s3589_s1 + $0x140] sm:$0xff]  ;;  %v61_v51 = vld [vmem:[%s3589_s1 + $0x148] sm:$0xff]  ;;  %v200_v61 = vmul.f32 %v2466_v45, %v2466_v45  ;;  %v201_v4 = vmul.f32 %v57_v46, %v57_v46  ;;  %v202_v9 = vmul.f32 %v58_v47, %v58_v47 }
  0x36   :  { %v333_v24 = vadd.f32 %v332_v20, %v190_v16  ;;  %v2488_v54 = vld [vmem:[%s3589_s1 + $0x150] sm:$0xff]  ;;  %v63_v55 = vld [vmem:[%s3589_s1 + $0x158] sm:$0xff]  ;;  %v64_v56 = vld [vmem:[%s3589_s1 + $0x160] sm:$0xff]  ;;  %v203_v10 = vmul.f32 %v2477_v48, %v2477_v48  ;;  %v204_v11 = vmul.f32 %v60_v50, %v60_v50  ;;  %v2544_v18 = vmul.f32 %v61_v51, %v61_v51 }
  0x37   :  { %v2499_v57 = vld [vmem:[%s3589_s1 + $0x168] sm:$0xff]  ;;  %v66_v59 = vld [vmem:[%s3589_s1 + $0x170] sm:$0xff]  ;;  %v67_v60 = vld [vmem:[%s3589_s1 + $0x178] sm:$0xff]  ;;  %v2550_v20 = vmul.f32 %v63_v55, %v63_v55  ;;  %v2552_v21 = vmul.f32 %v64_v56, %v64_v56 }
  0x38   :  { %v334_v27 = vadd.f32 %v333_v24, %v191_v19  ;;  %v68_v63 = vld [vmem:[%s3589_s1 + $0x180] sm:$0xff]  ;;  %v2515_v1 = vld [vmem:[%s3589_s1 + $0x188] sm:$0xff]  ;;  %v70_v2 = vld [vmem:[%s3589_s1 + $0x190] sm:$0xff]  ;;  %v2548_v19 = vmul.f32 %v2488_v54, %v2488_v54  ;;  %v2569_v28 = vmul.f32 %v66_v59, %v66_v59 }
  0x39   :  { %v71_v6 = vld [vmem:[%s3589_s1 + $0x198] sm:$0xff]  ;;  %v2526_v7 = vld [vmem:[%s3589_s1 + $0x1a0] sm:$0xff]  ;;  %v73_v8 = vld [vmem:[%s3589_s1 + $0x1a8] sm:$0xff]  ;;  %v2590_v38 = vmul.f32 %v70_v2, %v70_v2 }
  0x3a   :  { %v335_v30 = vadd.f32 %v334_v27, %v192_v23  ;;  %v74_v14 = vld [vmem:[%s3589_s1 + $0x1b0] sm:$0xff]  ;;  %v2539_v16 = vld [vmem:[%s3589_s1 + $0x1b8] sm:$0xff]  ;;  %v76_v17 = vld [vmem:[%s3589_s1 + $0x1c0] sm:$0xff]  ;;  %v2567_v27 = vmul.f32 %v2499_v57, %v2499_v57  ;;  %v2609_v46 = vmul.f32 %v73_v8, %v73_v8 }
  0x3b   :  { %v77_v23 = vld [vmem:[%s3589_s1 + $0x1c8] sm:$0xff]  ;;  %v2560_v24 = vld [vmem:[%s3589_s1 + $0x1d0] sm:$0xff]  ;;  %v80_v32 = vld [vmem:[%s3589_s1 + $0x1e0] sm:$0xff]  ;;  %v2611_v47 = vmul.f32 %v74_v14, %v74_v14  ;;  %v2626_v55 = vmul.f32 %v2539_v16, %v2539_v16  ;;  %v2628_v56 = vmul.f32 %v76_v17, %v76_v17 }
  0x3c   :  { %v336_v34 = vadd.f32 %v335_v30, %v193_v26  ;;  %3642 = vst [vmem:[#allocation6_spill] sm:$0xff] %v2560_v24  ;;  %v79_v26 = vld [vmem:[%s3589_s1 + $0x1d8] sm:$0xff]  ;;  %v2600_v42 = vld [vmem:[%s3589_s1 + $0x200] sm:$0xff]  ;;  %v86_v51 = vld [vmem:[%s3589_s1 + $0x210] sm:$0xff]  ;;  %v2630_v59 = vmul.f32 %v77_v23, %v77_v23 }
  0x3d   :  { %3644 = vst [vmem:[#allocation8_spill] sm:$0xff] %v2600_v42  ;;  %v2647_v2 = vmul.f32 %v79_v26, %v79_v26  ;;  %v2664_v23 = vmul.f32 %v2600_v42, %v2600_v42 }
  0x3e   :  { %v337_v37 = vadd.f32 %v336_v34, %v194_v29  ;;  %v2571_v29 = vmul.f32 %v67_v60, %v67_v60  ;;  %v82_v34 = vld [vmem:[%s3589_s1 + $0x1f0] sm:$0xff]  ;;  %v2634_v60 = vmul.f32 %v2560_v24, %v2560_v24 }
  0x3f   :  { %v2658_v14 = vmul.f32 %v82_v34, %v82_v34  ;;  %3648 = vst [vmem:[#allocation12_spill] sm:$0xff] %v2664_v23 }
  0x40   :  { %v338_v41 = vadd.f32 %v337_v37, %v195_v33  ;;  %v2579_v33 = vld [vmem:[%s3589_s1 + $0x1e8] sm:$0xff]  ;;  %v2588_v37 = vmul.f32 %v2515_v1, %v2515_v1 }
  0x41   :  { %3643 = vst [vmem:[#allocation7_spill] sm:$0xff] %v2579_v33 }
  0x42   :  { %v339_v44 = vadd.f32 %v338_v41, %v196_v36  ;;  %v2584_v36 = vmul.f32 %v68_v63, %v68_v63  ;;  %v83_v41 = vld [vmem:[%s3589_s1 + $0x1f8] sm:$0xff] }
  0x43   :  { %v91_v63 = vld [vmem:[%s3589_s1 + $0x238] sm:$0xff]  ;;  %v2660_v17 = vmul.f32 %v83_v41, %v83_v41 }
  0x44   :  { %v340_v53 = vadd.f32 %v339_v44, %v197_v39  ;;  %v2592_v39 = vmul.f32 %v71_v6, %v71_v6  ;;  %v2607_v44 = vmul.f32 %v2526_v7, %v2526_v7  ;;  %v2653_v6 = vmul.f32 %v2579_v33, %v2579_v33 }
  0x45   :  { %3647 = vst [vmem:[#allocation11_spill] sm:$0xff] %v2660_v17 }
  0x46   :  { %v341_v62 = vadd.f32 %v340_v53, %v198_v43  ;;  %v85_v43 = vld [vmem:[%s3589_s1 + $0x208] sm:$0xff]  ;;  %v88_v53 = vld [vmem:[%s3589_s1 + $0x220] sm:$0xff] }
  0x47   :  { %v2666_v26 = vmul.f32 %v85_v43, %v85_v43  ;;  %v95_v43 = vld [vmem:[%s3589_s1 + $0x258] sm:$0xff] }
  0x48   :  { %v342_v12 = vadd.f32 %v341_v62, %v199_v52  ;;  %v2619_v52 = vld [vmem:[%s3589_s1 + $0x218] sm:$0xff]  ;;  %v2642_v62 = vld [vmem:[%s3589_s1 + $0x230] sm:$0xff] }
  0x49   :  { %3645 = vst [vmem:[#allocation9_spill] sm:$0xff] %v2619_v52  ;;  %3646 = vst [vmem:[#allocation10_spill] sm:$0xff] %v2642_v62  ;;  %v2680_v34 = vmul.f32 %v2619_v52, %v2619_v52  ;;  %v2691_v17 = vmul.f32 %v2642_v62, %v2642_v62 }
  0x4a   :  { %v343_v30 = vadd.f32 %v342_v12, %v200_v61  ;;  %v89_v61 = vld [vmem:[%s3589_s1 + $0x228] sm:$0xff]  ;;  %v92_v12 = vld [vmem:[%s3589_s1 + $0x240] sm:$0xff]  ;;  %3649 = vst [vmem:[#allocation13_spill] sm:$0xff] %v2666_v26  ;;  %v2685_v26 = vmul.f32 %v88_v53, %v88_v53  ;;  %v2707_v53 = vstv %s3588_s0  ;;  %s2266_s0 = scalar_lea.vmem %s2096_s26, 16 }
  0x4b   :  { %3652 = vst [vmem:[#allocation16_spill] sm:$0xff] %v2680_v34  ;;  %v2687_v23 = vmul.f32 %v89_v61, %v89_v61  ;;  %3653 = vst [vmem:[#allocation17_spill] sm:$0xff] %v2691_v17  ;;  %v2698_v34 = vld [vmem:[%s3589_s1 + $0x260] sm:$0xff]  ;;  %p2267_p0 = scmp.ne.s32.totalorder %s2096_s26, %s2266_s0  ;;  %p2272_p2 = scmp.lt.s32.totalorder %s2270_s27, %s2266_s0 }
  0x4c   :  { %v344_v50 = vadd.f32 %v343_v30, %v201_v4  ;;  %v2649_v4 = vmul.f32 %v80_v32, %v80_v32  ;;  %v2671_v30 = vld [vmem:[%s3589_s1 + $0x248] sm:$0xff]  ;;  %v2676_v32 = vmul.f32 %v86_v51, %v86_v51  ;;  %v2693_v51 = vmul.f32 %v91_v63, %v91_v63  ;;  %3655 = vst [vmem:[#allocation19_spill] sm:$0xff] %v2698_v34 }
  0x4d   :  { %3650 = vst [vmem:[#allocation14_spill] sm:$0xff] %v2671_v30  ;;  %v2711_v61 = vmul.f32 %v2671_v30, %v2671_v30  ;;  %p2273_p3 = por %p2272_p2, %p2271_p1 }
  0x4e   :  { %v345_v8 = vadd.f32 %v344_v50, %v202_v9  ;;  %v94_v9 = vld [vmem:[%s3589_s1 + $0x250] sm:$0xff]  ;;  %3651 = vst [vmem:[#allocation15_spill] sm:$0xff] %v2676_v32  ;;  %v472_v50 = vlaneseq  ;;  %3654 = vst [vmem:[#allocation18_spill] sm:$0xff] %v2693_v51  ;;  %v1352_v51 = vmul.f32 %v2707_v53, %v2310_v0 }
  0x4f   :  { %3657 = vst [vmem:[#allocation21_spill] sm:$0xff] %v2711_v61  ;;  %v2713_v63 = vmul.f32 %v94_v9, %v94_v9  ;;  %v2729_v61 = vmul.f32 %v2698_v34, %v2698_v34  ;;  %v1358_v9 = vmul.f32 %v2707_v53, %v2336_v13  ;;  %p2274_p4 = pnand %p2273_p3, %p2267_p0 }
  0x50   :  { %v346_v41 = vadd.f32 %v345_v8, %v203_v10  ;;  %v2700_v10 = vmul.f32 %v92_v12, %v92_v12  ;;  %v2702_v32 = vshrl.u32 %v472_v50, 7  ;;  %v1355_v12 = vmul.f32 %v2707_v53, %v2321_v3 }
  0x51   :  { %3658 = vst [vmem:[#allocation22_spill] sm:$0xff] %v2713_v63  ;;  %v2725_v17 = vand.u32 127, %v472_v50  ;;  %v2103_v0 = vadd.f32 -1.0, %v1352_v51  ;;  %v2109_v50 = vadd.f32 -1.0, %v1358_v9 }
  0x52   :  { %3656 = vst [vmem:[#allocation20_spill] sm:$0xff] %v2700_v10  ;;  %v347_v8 = vadd.f32 %v346_v41, %v204_v11  ;;  %v2719_v11 = vmul.f32 %v95_v43, %v95_v43  ;;  %v2723_v10 = vadd.s32 8, %v2702_v32  ;;  %v2106_v63 = vadd.f32 -1.0, %v1355_v12 }
  0x53   :  { %v2735_v43 = vadd.s32 16, %v2702_v32  ;;  %vm623_vm0 = vcmp.eq.s32.totalorder %v2702_v32, %v2725_v17 }
  0x54   :  { %v348_v41 = vadd.f32 %v347_v8, %v2544_v18  ;;  %3659 = vst [vmem:[#allocation23_spill] sm:$0xff] %v2723_v10  ;;  %vm626_vm1 = vcmp.eq.s32.totalorder %v2723_v10, %v2725_v17  ;;  %v1361_v18 = vmul.f32 %v2707_v53, %v2349_v22  ;;  %v1640_v13 = vsel %vm623_vm0, %v2103_v0, 0.0 }
  0x55   :  { %v2751_v8 = vadd.s32 24, %v2702_v32  ;;  %vm629_vm2 = vcmp.eq.s32.totalorder %v2735_v43, %v2725_v17  ;;  %v1784_v12 = vmul.f32 %v1640_v13, %v1640_v13  ;;  %v1364_v22 = vmul.f32 %v2707_v53, %v2362_v31 }
  0x56   :  { %v349_v3 = vadd.f32 %v348_v41, %v2548_v19  ;;  %v1643_v19 = vsel %vm626_vm1, %v2106_v63, 0.0  ;;  %v2112_v41 = vadd.f32 -1.0, %v1361_v18  ;;  %v1646_v9 = vsel %vm629_vm2, %v2109_v50, 0.0 }
  0x57   :  { %v1787_v0 = vmul.f32 %v1643_v19, %v1643_v19  ;;  %vm632_vm3 = vcmp.eq.s32.totalorder %v2751_v8, %v2725_v17  ;;  %v1367_v13 = vmul.f32 %v2707_v53, %v2375_v40  ;;  %v2115_v10 = vadd.f32 -1.0, %v1364_v22 }
  0x58   :  { %v350_v51 = vadd.f32 %v349_v3, %v2550_v20  ;;  %v2762_v20 = vadd.s32 32, %v2702_v32  ;;  %v1790_v3 = vmul.f32 %v1646_v9, %v1646_v9  ;;  %v1649_v31 = vsel %vm632_vm3, %v2112_v41, 0.0 }
  0x59   :  { %v1930_v18 = vadd.f32 %v1787_v0, %v1784_v12  ;;  %v1793_v19 = vmul.f32 %v1649_v31, %v1649_v31  ;;  %v2118_v9 = vadd.f32 -1.0, %v1367_v13  ;;  %v1373_v0 = vmul.f32 %v2707_v53, %v2401_v58 }
  0x5a   :  { %v351_v63 = vadd.f32 %v350_v51, %v2552_v21  ;;  %v2773_v21 = vadd.s32 40, %v2702_v32  ;;  %vm635_vm4 = vcmp.eq.s32.totalorder %v2762_v20, %v2725_v17  ;;  %v1370_v51 = vmul.f32 %v2707_v53, %v2388_v49  ;;  %v115_v20 = vld [vmem:[%s3589_s1 + $0x2f8] sm:$0xff] }
  0x5b   :  { %v1652_v40 = vsel %vm635_vm4, %v2115_v10, 0.0  ;;  %v1933_v22 = vadd.f32 %v1930_v18, %v1790_v3  ;;  %v1376_v31 = vmul.f32 %v2707_v53, %v2414_v5  ;;  %v2124_v18 = vadd.f32 -1.0, %v1373_v0 }
  0x5c   :  { %v352_v50 = vadd.f32 %v351_v63, %v2567_v27  ;;  %v2784_v27 = vadd.s32 48, %v2702_v32  ;;  %vm638_vm5 = vcmp.eq.s32.totalorder %v2773_v21, %v2725_v17  ;;  %v1796_v41 = vmul.f32 %v1652_v40, %v1652_v40 }
  0x5d   :  { %v2121_v63 = vadd.f32 -1.0, %v1370_v51  ;;  %v1655_v49 = vsel %vm638_vm5, %v2118_v9, 0.0  ;;  %v1936_v13 = vadd.f32 %v1933_v22, %v1793_v19  ;;  %v1379_v9 = vmul.f32 %v2707_v53, %v2427_v15 }
  0x5e   :  { %v353_v12 = vadd.f32 %v352_v50, %v2569_v28  ;;  %v2795_v28 = vadd.s32 56, %v2702_v32  ;;  %vm641_vm6 = vcmp.eq.s32.totalorder %v2784_v27, %v2725_v17  ;;  %v1799_v3 = vmul.f32 %v1655_v49, %v1655_v49 }
  0x5f   :  { %v1658_v58 = vsel %vm641_vm6, %v2121_v63, 0.0  ;;  %v1939_v50 = vadd.f32 %v1936_v13, %v1796_v41  ;;  %v2127_v40 = vadd.f32 -1.0, %v1376_v31  ;;  %v1382_v0 = vmul.f32 %v2707_v53, %v2440_v25 }
  0x60   :  { %v354_v10 = vadd.f32 %v353_v12, %v2571_v29  ;;  %v2806_v29 = vadd.s32 64, %v2702_v32  ;;  %vm644_vm7 = vcmp.eq.s32.totalorder %v2795_v28, %v2725_v17  ;;  %v1802_v51 = vmul.f32 %v1658_v58, %v1658_v58 }
  0x61   :  { %v1661_v5 = vsel %vm644_vm7, %v2124_v18, 0.0  ;;  %v1942_v22 = vadd.f32 %v1939_v50, %v1799_v3  ;;  %v2130_v63 = vadd.f32 -1.0, %v1379_v9  ;;  %v1385_v3 = vmul.f32 %v2707_v53, %v2453_v35 }
  0x62   :  { %v355_v19 = vadd.f32 %v354_v10, %v2584_v36  ;;  %v2817_v36 = vadd.s32 72, %v2702_v32  ;;  %vm647_vm8 = vcmp.eq.s32.totalorder %v2806_v29, %v2725_v17  ;;  %v1805_v41 = vmul.f32 %v1661_v5, %v1661_v5  ;;  %v119_v29 = vld [vmem:[%s3589_s1 + $0x318] sm:$0xff] }
  0x63   :  { %v1664_v15 = vsel %vm647_vm8, %v2127_v40, 0.0  ;;  %v1945_v49 = vadd.f32 %v1942_v22, %v1802_v51  ;;  %v2133_v31 = vadd.f32 -1.0, %v1382_v0  ;;  %v1388_v51 = vmul.f32 %v2707_v53, %v2466_v45 }
  0x64   :  { %v356_v12 = vadd.f32 %v355_v19, %v2588_v37  ;;  %v2828_v37 = vadd.s32 80, %v2702_v32  ;;  %vm650_vm9 = vcmp.eq.s32.totalorder %v2817_v36, %v2725_v17  ;;  %v1808_v10 = vmul.f32 %v1664_v15, %v1664_v15 }
  0x65   :  { %v1667_v18 = vsel %vm650_vm9, %v2130_v63, 0.0  ;;  %v1948_v58 = vadd.f32 %v1945_v49, %v1805_v41  ;;  %v2136_v9 = vadd.f32 -1.0, %v1385_v3  ;;  %v1391_v41 = vmul.f32 %v2707_v53, %v2477_v48 }
  0x66   :  { %v357_v13 = vadd.f32 %v356_v12, %v2590_v38  ;;  %v2839_v38 = vadd.s32 88, %v2702_v32  ;;  %vm653_vm10 = vcmp.eq.s32.totalorder %v2828_v37, %v2725_v17  ;;  %v1811_v19 = vmul.f32 %v1667_v18, %v1667_v18 }
  0x67   :  { %v1670_v40 = vsel %vm653_vm10, %v2133_v31, 0.0  ;;  %v1951_v5 = vadd.f32 %v1948_v58, %v1808_v10  ;;  %v2139_v0 = vadd.f32 -1.0, %v1388_v51  ;;  %v1394_v10 = vmul.f32 %v2707_v53, %v2488_v54 }
  0x68   :  { %v358_v50 = vadd.f32 %v357_v13, %v2592_v39  ;;  %v2850_v39 = vadd.s32 96, %v2702_v32  ;;  %vm3637_vm11 = vcmp.eq.s32.totalorder %v2839_v38, %v2725_v17  ;;  %v1814_v12 = vmul.f32 %v1670_v40, %v1670_v40 }
  0x69   :  { %v1673_v63 = vsel %vm3637_vm11, %v2136_v9, 0.0  ;;  %v1954_v15 = vadd.f32 %v1951_v5, %v1811_v19  ;;  %v2142_v3 = vadd.f32 -1.0, %v1391_v41  ;;  %v1397_v19 = vmul.f32 %v2707_v53, %v2499_v57 }
  0x6a   :  { %v359_v22 = vadd.f32 %v358_v50, %v2607_v44  ;;  %v2861_v44 = vadd.s32 104, %v2702_v32  ;;  %vm3636_vm12 = vcmp.eq.s32.totalorder %v2850_v39, %v2725_v17  ;;  %v1817_v13 = vmul.f32 %v1673_v63, %v1673_v63 }
  0x6b   :  { %v1676_v31 = vsel %vm3636_vm12, %v2139_v0, 0.0  ;;  %v1957_v18 = vadd.f32 %v1954_v15, %v1814_v12  ;;  %v2145_v51 = vadd.f32 -1.0, %v1394_v10  ;;  %v1401_v12 = vmul.f32 %v2707_v53, %v2515_v1 }
  0x6c   :  { %v360_v49 = vadd.f32 %v359_v22, %v2609_v46  ;;  %v2872_v46 = vadd.s32 112, %v2702_v32  ;;  %vm3629_vm13 = vcmp.eq.s32.totalorder %v2861_v44, %v2725_v17  ;;  %v1820_v50 = vmul.f32 %v1676_v31, %v1676_v31 }
  0x6d   :  { %v1679_v9 = vsel %vm3629_vm13, %v2142_v3, 0.0  ;;  %v1960_v40 = vadd.f32 %v1957_v18, %v1817_v13  ;;  %v2148_v41 = vadd.f32 -1.0, %v1397_v19  ;;  %v1404_v13 = vmul.f32 %v2707_v53, %v2526_v7 }
  0x6e   :  { %v361_v58 = vadd.f32 %v360_v49, %v2611_v47  ;;  %v2883_v47 = vadd.s32 120, %v2702_v32  ;;  %vm3592_vm14 = vcmp.eq.s32.totalorder %v2872_v46, %v2725_v17  ;;  %v1823_v22 = vmul.f32 %v1679_v9, %v1679_v9 }
  0x6f   :  { %v1682_v0 = vsel %vm3592_vm14, %v2145_v51, 0.0  ;;  %v1963_v63 = vadd.f32 %v1960_v40, %v1820_v50  ;;  %v2897_v49 = vadd.s32 128, %v2725_v17  ;;  %v2152_v10 = vadd.f32 -1.0, %v1401_v12 }
  0x70   :  { %v362_v5 = vadd.f32 %v361_v58, %v2626_v55  ;;  %v2894_v55 = vadd.s32 128, %v2702_v32  ;;  %vm3593_vm15 = vcmp.eq.s32.totalorder %v2883_v47, %v2725_v17  ;;  %v1826_v31 = vmul.f32 %v1682_v0, %v1682_v0 }
  0x71   :  { %v1685_v3 = vsel %vm3593_vm15, %v2148_v41, 0.0  ;;  %v2908_v18 = vadd.s32 136, %v2702_v32  ;;  %v1407_v50 = vmul.f32 %v2707_v53, %v2539_v16  ;;  %v2155_v19 = vadd.f32 -1.0, %v1404_v13 }
  0x72   :  { %v363_v15 = vadd.f32 %v362_v5, %v2628_v56  ;;  %vm3594_vm14 = vcmp.eq.s32.totalorder %v2894_v55, %v2897_v49  ;;  %v1829_v58 = vmul.f32 %v1685_v3, %v1685_v3  ;;  %v1966_v51 = vadd.f32 %v1963_v63, %v1823_v22 }
  0x73   :  { %v1689_v7 = vsel %vm3594_vm14, %v2152_v10, 0.0  ;;  %vm3595_vm15 = vcmp.eq.s32.totalorder %v2908_v18, %v2897_v49  ;;  %v1410_v5 = vmul.f32 %v2707_v53, %v2560_v24  ;;  %v2158_v12 = vadd.f32 -1.0, %v1407_v50 }
  0x74   :  { %v364_v56 = vadd.f32 %v363_v15, %v2630_v59  ;;  %v2919_v59 = vadd.s32 144, %v2702_v32  ;;  %v1833_v40 = vmul.f32 %v1689_v7, %v1689_v7  ;;  %v1692_v41 = vsel %vm3595_vm15, %v2155_v19, 0.0 }
  0x75   :  { %v1969_v0 = vadd.f32 %v1966_v51, %v1826_v31  ;;  %v1836_v63 = vmul.f32 %v1692_v41, %v1692_v41  ;;  %v1413_v15 = vmul.f32 %v2707_v53, %v2579_v33  ;;  %v2161_v13 = vadd.f32 -1.0, %v1410_v5  ;;  %v3685_v33 = vld [vmem:[#allocation22_spill] sm:$0xff] }
  0x76   :  { %v365_v9 = vadd.f32 %v364_v56, %v2634_v60  ;;  %v2930_v60 = vadd.s32 152, %v2702_v32  ;;  %vm3596_vm14 = vcmp.eq.s32.totalorder %v2919_v59, %v2897_v49  ;;  %v1416_v50 = vmul.f32 %v2707_v53, %v2600_v42 }
  0x77   :  { %v1695_v10 = vsel %vm3596_vm14, %v2158_v12, 0.0  ;;  %v1972_v3 = vadd.f32 %v1969_v0, %v1829_v58  ;;  %v2164_v19 = vadd.f32 -1.0, %v1413_v15  ;;  %v1419_v5 = vmul.f32 %v2707_v53, %v2619_v52 }
  0x78   :  { %v366_v22 = vadd.f32 %v365_v9, %v2647_v2  ;;  %3660 = vst [vmem:[#allocation24_spill] sm:$0xff] %v2930_v60  ;;  %v2941_v2 = vadd.s32 160, %v2702_v32  ;;  %vm3597_vm15 = vcmp.eq.s32.totalorder %v2930_v60, %v2897_v49  ;;  %v1839_v56 = vmul.f32 %v1695_v10, %v1695_v10 }
  0x79   :  { %v1698_v7 = vsel %vm3597_vm15, %v2161_v13, 0.0  ;;  %v1976_v51 = vadd.f32 %v1972_v3, %v1833_v40  ;;  %v2167_v12 = vadd.f32 -1.0, %v1416_v50  ;;  %v1422_v15 = vmul.f32 %v2707_v53, %v2642_v62 }
  0x7a   :  { %v367_v31 = vadd.f32 %v366_v22, %v2649_v4  ;;  %3661 = vst [vmem:[#allocation25_spill] sm:$0xff] %v2941_v2  ;;  %v2952_v4 = vadd.s32 168, %v2702_v32  ;;  %vm3598_vm14 = vcmp.eq.s32.totalorder %v2941_v2, %v2897_v49  ;;  %v1842_v9 = vmul.f32 %v1698_v7, %v1698_v7 }
  0x7b   :  { %v1701_v41 = vsel %vm3598_vm14, %v2164_v19, 0.0  ;;  %v1979_v0 = vadd.f32 %v1976_v51, %v1836_v63  ;;  %v2170_v13 = vadd.f32 -1.0, %v1419_v5  ;;  %v1425_v19 = vmul.f32 %v2707_v53, %v2671_v30  ;;  %v3666_v5 = vld [vmem:[#allocation12_spill] sm:$0xff] }
  0x7c   :  { %v368_v58 = vadd.f32 %v367_v31, %v2653_v6  ;;  %3662 = vst [vmem:[#allocation26_spill] sm:$0xff] %v2952_v4  ;;  %v2963_v6 = vadd.s32 176, %v2702_v32  ;;  %vm3599_vm15 = vcmp.eq.s32.totalorder %v2952_v4, %v2897_v49  ;;  %v1845_v22 = vmul.f32 %v1701_v41, %v1701_v41  ;;  %v3664_v31 = vld [vmem:[#allocation11_spill] sm:$0xff] }
  0x7d   :  { %v1704_v10 = vsel %vm3599_vm15, %v2167_v12, 0.0  ;;  %v1982_v3 = vadd.f32 %v1979_v0, %v1839_v56  ;;  %v2173_v7 = vadd.f32 -1.0, %v1422_v15  ;;  %v2985_v12 = vadd.s32 192, %v2702_v32 }
  0x7e   :  { %v369_v40 = vadd.f32 %v368_v58, %v2658_v14  ;;  %3663 = vst [vmem:[#allocation27_spill] sm:$0xff] %v2963_v6  ;;  %v2974_v14 = vadd.s32 184, %v2702_v32  ;;  %vm3600_vm14 = vcmp.eq.s32.totalorder %v2963_v6, %v2897_v49  ;;  %v1848_v50 = vmul.f32 %v1704_v10, %v1704_v10 }
  0x7f   :  { %v1707_v51 = vsel %vm3600_vm14, %v2170_v13, 0.0  ;;  %v1985_v58 = vadd.f32 %v1982_v3, %v1842_v9  ;;  %3667 = vst [vmem:[#allocation12_spill] sm:$0xff] %v2985_v12  ;;  %v1428_v0 = vmul.f32 %v2707_v53, %v2698_v34  ;;  %v2997_v9 = vld [vmem:[%s3589_s1 + $0x278] sm:$0xff]  ;;  %vm3604_vm14 = vcmp.eq.s32.totalorder %v2985_v12, %v2897_v49 }
  0x80   :  { %v370_v63 = vadd.f32 %v369_v40, %v3664_v31  ;;  %3665 = vst [vmem:[#allocation11_spill] sm:$0xff] %v2974_v14  ;;  %vm3601_vm15 = vcmp.eq.s32.totalorder %v2974_v14, %v2897_v49  ;;  %v1851_v41 = vmul.f32 %v1707_v51, %v1707_v51  ;;  %v2176_v40 = vadd.f32 -1.0, %v1425_v19  ;;  %3668 = vst [vmem:[#allocation28_spill] sm:$0xff] %v2997_v9  ;;  %v3669_v13 = vld [vmem:[#allocation13_spill] sm:$0xff] }
  0x81   :  { %v1710_v15 = vsel %vm3601_vm15, %v2173_v7, 0.0  ;;  %v1988_v10 = vadd.f32 %v1985_v58, %v1845_v22  ;;  %v3001_v31 = vadd.s32 200, %v2702_v32  ;;  %v1431_v19 = vmul.f32 %v2707_v53, %v2997_v9  ;;  %v3013_v58 = vld [vmem:[%s3589_s1 + $0x290] sm:$0xff] }
  0x82   :  { %v371_v56 = vadd.f32 %v370_v63, %v3666_v5  ;;  %v1854_v63 = vmul.f32 %v1710_v15, %v1710_v15  ;;  %v2179_v51 = vadd.f32 -1.0, %v1428_v0  ;;  %v1713_v22 = vsel %vm3604_vm14, %v2176_v40, 0.0  ;;  %v3671_v5 = vld [vmem:[#allocation15_spill] sm:$0xff] }
  0x83   :  { %3670 = vst [vmem:[#allocation13_spill] sm:$0xff] %v3001_v31  ;;  %v1991_v7 = vadd.f32 %v1988_v10, %v1848_v50  ;;  %vm3606_vm15 = vcmp.eq.s32.totalorder %v3001_v31, %v2897_v49  ;;  %v1857_v15 = vmul.f32 %v1713_v22, %v1713_v22  ;;  %v1434_v0 = vmul.f32 %v2707_v53, %v3013_v58  ;;  %v3029_v10 = vld [vmem:[%s3589_s1 + $0x2a8] sm:$0xff] }
  0x84   :  { %v372_v3 = vadd.f32 %v371_v56, %v3669_v13  ;;  %v3017_v13 = vadd.s32 208, %v2702_v32  ;;  %v2182_v34 = vadd.f32 -1.0, %v1431_v19  ;;  %v1716_v50 = vsel %vm3606_vm15, %v2179_v51, 0.0 }
  0x85   :  { %v1994_v40 = vadd.f32 %v1991_v7, %v1851_v41  ;;  %v3033_v12 = vadd.s32 216, %v2702_v32  ;;  %v1860_v22 = vmul.f32 %v1716_v50, %v1716_v50  ;;  %v1437_v19 = vmul.f32 %v2707_v53, %v3029_v10  ;;  %v3045_v7 = vld [vmem:[%s3589_s1 + $0x2c0] sm:$0xff] }
  0x86   :  { %v373_v56 = vadd.f32 %v372_v3, %v3671_v5  ;;  %3672 = vst [vmem:[#allocation15_spill] sm:$0xff] %v3017_v13  ;;  %v3673_v3 = vld [vmem:[#allocation16_spill] sm:$0xff]  ;;  %vm3608_vm14 = vcmp.eq.s32.totalorder %v3017_v13, %v2897_v49  ;;  %v2185_v31 = vadd.f32 -1.0, %v1434_v0  ;;  %v97_v0 = vld [vmem:[%s3589_s1 + $0x268] sm:$0xff]  ;;  %v3068_v13 = vadd.s32 232, %v2702_v32 }
  0x87   :  { %3674 = vst [vmem:[#allocation16_spill] sm:$0xff] %v3033_v12  ;;  %v1719_v41 = vsel %vm3608_vm14, %v2182_v34, 0.0  ;;  %v1997_v51 = vadd.f32 %v1994_v40, %v1854_v63  ;;  %vm3612_vm15 = vcmp.eq.s32.totalorder %v3033_v12, %v2897_v49  ;;  %v1440_v34 = vmul.f32 %v2707_v53, %v3045_v7 }
  0x88   :  { %v374_v5 = vadd.f32 %v373_v56, %v3673_v3  ;;  %v3049_v3 = vadd.s32 224, %v2702_v32  ;;  %v1863_v50 = vmul.f32 %v1719_v41, %v1719_v41  ;;  %v2188_v63 = vadd.f32 -1.0, %v1437_v19  ;;  %3676 = vst [vmem:[#allocation30_spill] sm:$0xff] %v3068_v13 }
  0x89   :  { %v1722_v40 = vsel %vm3612_vm15, %v2185_v31, 0.0  ;;  %v2191_v12 = vadd.f32 -1.0, %v1440_v34  ;;  %vm3619_vm15 = vcmp.eq.s32.totalorder %v3068_v13, %v2897_v49  ;;  %v3102_v62 = vadd.s32 248, %v2702_v32 }
  0x8a   :  { %v375_v56 = vadd.f32 %v374_v5, %v2685_v26  ;;  %3675 = vst [vmem:[#allocation29_spill] sm:$0xff] %v3049_v3  ;;  %v2000_v26 = vadd.f32 %v1997_v51, %v1857_v15  ;;  %v3064_v5 = vld [vmem:[%s3589_s1 + $0x2d8] sm:$0xff]  ;;  %vm3615_vm14 = vcmp.eq.s32.totalorder %v3049_v3, %v2897_v49  ;;  %v1866_v30 = vmul.f32 %v1722_v40, %v1722_v40  ;;  %v98_v3 = vld [vmem:[%s3589_s1 + $0x270] sm:$0xff] }
  0x8b   :  { %v1443_v19 = vmul.f32 %v2707_v53, %v3064_v5  ;;  %v1725_v31 = vsel %vm3615_vm14, %v2188_v63, 0.0  ;;  %v3082_v51 = vmul.f32 %v97_v0, %v97_v0  ;;  %v3086_v40 = vadd.s32 240, %v2702_v32  ;;  %v3098_v0 = vld [vmem:[%s3589_s1 + $0x310] sm:$0xff] }
  0x8c   :  { %v376_v41 = vadd.f32 %v375_v56, %v2687_v23  ;;  %v2003_v15 = vadd.f32 %v2000_v26, %v1860_v22  ;;  %v3080_v23 = vld [vmem:[%s3589_s1 + $0x2f0] sm:$0xff]  ;;  %v3677_v56 = vld [vmem:[#allocation17_spill] sm:$0xff]  ;;  %v1869_v22 = vmul.f32 %v1725_v31, %v1725_v31  ;;  %v3121_v4 = vadd.s32 256, %v2702_v32 }
  0x8d   :  { %3678 = vst [vmem:[#allocation17_spill] sm:$0xff] %v3086_v40  ;;  %v1446_v34 = vmul.f32 %v2707_v53, %v3080_v23  ;;  %v2194_v63 = vadd.f32 -1.0, %v1443_v19  ;;  %vm3622_vm14 = vcmp.eq.s32.totalorder %v3086_v40, %v2897_v49  ;;  %v1450_v19 = vmul.f32 %v2707_v53, %v3098_v0  ;;  %v3133_v40 = vld [vmem:[%s3589_s1 + $0x340] sm:$0xff] }
  0x8e   :  { %v377_v14 = vadd.f32 %v376_v41, %v3677_v56  ;;  %v2006_v26 = vadd.f32 %v2003_v15, %v1863_v50  ;;  %v3679_v41 = vld [vmem:[#allocation18_spill] sm:$0xff]  ;;  %v1728_v50 = vsel %vm3619_vm15, %v2191_v12, 0.0  ;;  %v3124_v12 = vadd.s32 256, %v2725_v17 }
  0x8f   :  { %3680 = vst [vmem:[#allocation18_spill] sm:$0xff] %v3102_v62  ;;  %v2197_v31 = vadd.f32 -1.0, %v1446_v34  ;;  %v1731_v15 = vsel %vm3622_vm14, %v2194_v63, 0.0  ;;  %vm3628_vm15 = vcmp.eq.s32.totalorder %v3102_v62, %v2897_v49  ;;  %v242_v34 = vmul.f32 %v98_v3, %v98_v3 }
  0x90   :  { %v378_v56 = vadd.f32 %v377_v14, %v3679_v41  ;;  %v2009_v6 = vadd.f32 %v2006_v26, %v1866_v30  ;;  %v3117_v14 = vld [vmem:[%s3589_s1 + $0x328] sm:$0xff]  ;;  %v3681_v41 = vld [vmem:[#allocation20_spill] sm:$0xff]  ;;  %v2201_v63 = vadd.f32 -1.0, %v1450_v19  ;;  %v1872_v26 = vmul.f32 %v1728_v50, %v1728_v50 }
  0x91   :  { %3682 = vst [vmem:[#allocation20_spill] sm:$0xff] %v3121_v4  ;;  %v1453_v30 = vmul.f32 %v2707_v53, %v3117_v14  ;;  %v3137_v13 = vadd.s32 264, %v2702_v32  ;;  %vm3632_vm14 = vcmp.eq.s32.totalorder %v3121_v4, %v3124_v12  ;;  %v1734_v3 = vsel %vm3628_vm15, %v2197_v31, 0.0 }
  0x92   :  { %v379_v52 = vadd.f32 %v378_v56, %v3681_v41  ;;  %v3683_v56 = vld [vmem:[#allocation21_spill] sm:$0xff]  ;;  %v1456_v50 = vmul.f32 %v2707_v53, %v3133_v40  ;;  %v1875_v42 = vmul.f32 %v1731_v15, %v1731_v15  ;;  %v2012_v2 = vadd.f32 %v2009_v6, %v1869_v22 }
  0x93   :  { %3684 = vst [vmem:[#allocation21_spill] sm:$0xff] %v3137_v13  ;;  %v2204_v19 = vadd.f32 -1.0, %v1453_v30  ;;  %v3155_v24 = vadd.s32 272, %v2702_v32  ;;  %vm3633_vm15 = vcmp.eq.s32.totalorder %v3137_v13, %v3124_v12  ;;  %v1738_v22 = vsel %vm3632_vm14, %v2201_v63, 0.0  ;;  %v3167_v30 = vld [vmem:[%s3589_s1 + $0x370] sm:$0xff] }
  0x94   :  { %v380_v41 = vadd.f32 %v379_v52, %v3683_v56  ;;  %v3149_v52 = vld [vmem:[%s3589_s1 + $0x358] sm:$0xff]  ;;  %v243_v56 = vmul.f32 %v2997_v9, %v2997_v9  ;;  %v2207_v6 = vadd.f32 -1.0, %v1456_v50  ;;  %v2015_v15 = vadd.f32 %v2012_v2, %v1872_v26  ;;  %v101_v9 = vld [vmem:[%s3589_s1 + $0x288] sm:$0xff] }
  0x95   :  { %3686 = vst [vmem:[#allocation22_spill] sm:$0xff] %v3155_v24  ;;  %v1459_v31 = vmul.f32 %v2707_v53, %v3149_v52  ;;  %vm3639_vm13 = vcmp.eq.s32.totalorder %v3155_v24, %v3124_v12  ;;  %v1878_v62 = vmul.f32 %v1734_v3, %v1734_v3  ;;  %v1462_v50 = vmul.f32 %v2707_v53, %v3167_v30 }
  0x96   :  { %v381_v60 = vadd.f32 %v380_v41, %v3685_v33  ;;  %v3171_v41 = vadd.s32 280, %v2702_v32  ;;  %v1741_v2 = vsel %vm3633_vm15, %v2204_v19, 0.0  ;;  %v2018_v63 = vadd.f32 %v2015_v15, %v1875_v42 }
  0x97   :  { %v2210_v4 = vadd.f32 -1.0, %v1459_v31  ;;  %v3187_v26 = vadd.s32 288, %v2702_v32  ;;  %v1882_v3 = vmul.f32 %v1738_v22, %v1738_v22  ;;  %v100_v31 = vld [vmem:[%s3589_s1 + $0x280] sm:$0xff]  ;;  %v510_v42 = vadd.s32 296, %v2702_v32 }
  0x98   :  { %v382_v33 = vadd.f32 %v381_v60, %v2719_v11  ;;  %v3183_v11 = vld [vmem:[%s3589_s1 + $0x388] sm:$0xff]  ;;  %vm730_vm14 = vcmp.eq.s32.totalorder %v3171_v41, %v3124_v12  ;;  %v2213_v15 = vadd.f32 -1.0, %v1462_v50  ;;  %v1885_v22 = vmul.f32 %v1741_v2, %v1741_v2 }
  0x99   :  { %3687 = vst [vmem:[#allocation31_spill] sm:$0xff] %v3183_v11  ;;  %v1465_v19 = vmul.f32 %v2707_v53, %v3183_v11  ;;  %vm733_vm15 = vcmp.eq.s32.totalorder %v3187_v26, %v3124_v12  ;;  %v2021_v13 = vadd.f32 %v2018_v63, %v1878_v62  ;;  %vm612_vm12 = vcmp.lt.s32.totalorder %v510_v42, 300 }
  0x9a   :  { %v383_v60 = vadd.f32 %v382_v33, %v2729_v61  ;;  %v1744_v61 = vsel %vm3639_vm13, %v2207_v6, 0.0  ;;  %vm736_vm11 = vcmp.eq.s32.totalorder %v510_v42, %v3124_v12  ;;  %v1747_v50 = vsel %vm730_vm14, %v2210_v4, 0.0  ;;  %v103_v4 = vld [vmem:[%s3589_s1 + $0x298] sm:$0xff] }
  0x9b   :  { %v2216_v53 = vadd.f32 -1.0, %v1465_v19  ;;  %v244_v6 = vmul.f32 %v100_v31, %v100_v31  ;;  %vm3210_vm13 = vmand %vm736_vm11, %vm612_vm12  ;;  %v1888_v2 = vmul.f32 %v1744_v61, %v1744_v61  ;;  %v2025_v62 = vadd.f32 %v2021_v13, %v1882_v3 }
  0x9c   :  { %v384_v33 = vadd.f32 %v383_v60, %v3082_v51  ;;  %v1750_v63 = vsel %vm733_vm15, %v2213_v15, 0.0  ;;  %v245_v60 = vmul.f32 %v101_v9, %v101_v9  ;;  %v1891_v42 = vmul.f32 %v1747_v50, %v1747_v50  ;;  %v104_v9 = vld [vmem:[%s3589_s1 + $0x2a0] sm:$0xff] }
  0x9d   :  { %v2028_v19 = vadd.f32 %v2025_v62, %v1885_v22  ;;  %v246_v31 = vmul.f32 %v3013_v58, %v3013_v58  ;;  %v1894_v13 = vmul.f32 %v1750_v63, %v1750_v63  ;;  %v248_v22 = vmul.f32 %v104_v9, %v104_v9  ;;  %v107_v63 = vld [vmem:[%s3589_s1 + $0x2b8] sm:$0xff] }
  0x9e   :  { %v385_v24 = vadd.f32 %v384_v33, %v242_v34  ;;  %v1753_v34 = vsel %vm3210_vm13, %v2216_v53, 0.0  ;;  %v106_v53 = vld [vmem:[%s3589_s1 + $0x2b0] sm:$0xff]  ;;  %v255_v43 = vmul.f32 %v3064_v5, %v3064_v5  ;;  %v258_v21 = vmul.f32 %v3080_v23, %v3080_v23 }
  0x9f   :  { %v2031_v3 = vadd.f32 %v2028_v19, %v1888_v2  ;;  %v1897_v15 = vmul.f32 %v1753_v34, %v1753_v34  ;;  %v250_v19 = vmul.f32 %v106_v53, %v106_v53  ;;  %v109_v34 = vld [vmem:[%s3589_s1 + $0x2c8] sm:$0xff]  ;;  %v259_v27 = vmul.f32 %v115_v20, %v115_v20 }
  0xa0   :  { %v386_v11 = vadd.f32 %v385_v24, %v243_v56  ;;  %v247_v24 = vmul.f32 %v103_v4, %v103_v4 }
  0xa1   :  { %v2034_v33 = vadd.f32 %v2031_v3, %v1891_v42  ;;  %v251_v42 = vmul.f32 %v107_v63, %v107_v63  ;;  %v2255_v3 = vld [vmem:[%s3589_s1] sm:$0xff]  ;;  %v2258_v63 = vld [vmem:[%s3589_s1 + $0x48] sm:$0xff] }
  0xa2   :  { %v387_v61 = vadd.f32 %v386_v11, %v244_v6  ;;  %v249_v11 = vmul.f32 %v3029_v10, %v3029_v10  ;;  %v911_v9 = vsel %vm623_vm0, %v2255_v3, 0.0  ;;  %vm3691_vm0 = vcmp.eq.s32.totalorder %v2839_v38, %v2725_v17 }
  0xa3   :  { %v2037_v62 = vadd.f32 %v2034_v33, %v1894_v13  ;;  %v110_v13 = vld [vmem:[%s3589_s1 + $0x2d0] sm:$0xff]  ;;  %v253_v33 = vmul.f32 %v109_v34, %v109_v34  ;;  %v2259_v34 = vld [vmem:[%s3589_s1 + $0x60] sm:$0xff]  ;;  %v265_v38 = vmul.f32 %v3117_v14, %v3117_v14 }
  0xa4   :  { %v388_v56 = vadd.f32 %v387_v61, %v245_v60  ;;  %v254_v32 = vmul.f32 %v110_v13, %v110_v13 }
  0xa5   :  { %v2040_v2 = vadd.f32 %v2037_v62, %v1897_v15 }
  0xa6   :  { %v389_v50 = vadd.f32 %v388_v56, %v246_v31  ;;  %v252_v31 = vmul.f32 %v3045_v7, %v3045_v7 }
  0xa7   :  { %2071 = vadd.xlane.f32.xlu1 %v2040_v2  ;;  %v112_v2 = vld [vmem:[%s3589_s1 + $0x2e0] sm:$0xff] }
  0xa8   :  { %v390_v6 = vadd.f32 %v389_v50, %v247_v24  ;;  %v2256_v24 = vld [vmem:[%s3589_s1 + $0x18] sm:$0xff]  ;;  %v2257_v50 = vld [vmem:[%s3589_s1 + $0x30] sm:$0xff] }
  0xa9   :  { %v914_v15 = vsel %vm626_vm1, %v2256_v24, 0.0  ;;  %v917_v62 = vsel %vm629_vm2, %v2257_v50, 0.0  ;;  %v2261_v50 = vld [vmem:[%s3589_s1 + $0x90] sm:$0xff]  ;;  %vm3692_vm1 = vcmp.eq.s32.totalorder %v2850_v39, %v2725_v17  ;;  %vm3693_vm2 = vcmp.eq.s32.totalorder %v2861_v44, %v2725_v17 }
  0xaa   :  { %v391_v60 = vadd.f32 %v390_v6, %v248_v22  ;;  %v1058_v6 = vmul.f32 %v914_v15, %v914_v15 }
  0xac   :  { %v392_v4 = vadd.f32 %v391_v60, %v249_v11  ;;  %v1055_v11 = vmul.f32 %v911_v9, %v911_v9  ;;  %v2260_v9 = vld [vmem:[%s3589_s1 + $0x78] sm:$0xff] }
  0xad   :  { %v926_v24 = vsel %vm638_vm5, %v2260_v9, 0.0  ;;  %vm3696_vm5 = vcmp.eq.s32.totalorder %v2894_v55, %v2897_v49 }
  0xae   :  { %v393_v61 = vadd.f32 %v392_v4, %v250_v19  ;;  %v920_v19 = vsel %vm632_vm3, %v2258_v63, 0.0  ;;  %v113_v4 = vld [vmem:[%s3589_s1 + $0x2e8] sm:$0xff]  ;;  %v1201_v3 = vadd.f32 %v1058_v6, %v1055_v11  ;;  %v116_v6 = vld [vmem:[%s3589_s1 + $0x300] sm:$0xff]  ;;  %vm3694_vm3 = vcmp.eq.s32.totalorder %v2872_v46, %v2725_v17 }
  0xaf   :  { %v1064_v13 = vmul.f32 %v920_v19, %v920_v19  ;;  %v257_v56 = vmul.f32 %v113_v4, %v113_v4  ;;  %v2263_v4 = vld [vmem:[%s3589_s1 + $0xc0] sm:$0xff]  ;;  %v268_v46 = vmul.f32 %v3133_v40, %v3133_v40 }
  0xb0   :  { %v394_v22 = vadd.f32 %v393_v61, %v251_v42  ;;  %v1061_v42 = vmul.f32 %v917_v62, %v917_v62  ;;  %v256_v61 = vmul.f32 %v112_v2, %v112_v2  ;;  %v929_v62 = vsel %vm641_vm6, %v2261_v50, 0.0  ;;  %v2262_v2 = vld [vmem:[%s3589_s1 + $0xa8] sm:$0xff] }
  0xb1   :  { %v932_v63 = vsel %vm644_vm7, %v2262_v2, 0.0  ;;  %vm3697_vm6 = vcmp.eq.s32.totalorder %v2908_v18, %v2897_v49  ;;  %vm3698_vm7 = vcmp.eq.s32.totalorder %v2919_v59, %v2897_v49  ;;  %v3700_v18 = vld [vmem:[#allocation24_spill] sm:$0xff] }
  0xb2   :  { %v395_v53 = vadd.f32 %v394_v22, %v252_v31  ;;  %v923_v31 = vsel %vm635_vm4, %v2259_v34, 0.0  ;;  %v1204_v22 = vadd.f32 %v1201_v3, %v1061_v42  ;;  %v117_v42 = vld [vmem:[%s3589_s1 + $0x308] sm:$0xff]  ;;  %v935_v34 = vsel %vm647_vm8, %v2263_v4, 0.0 }
  0xb3   :  { %v1076_v28 = vmul.f32 %v932_v63, %v932_v63  ;;  %v261_v9 = vmul.f32 %v117_v42, %v117_v42  ;;  %v953_v42 = vsel %vm3694_vm3, %v2488_v54, 0.0  ;;  %vm3695_vm4 = vcmp.eq.s32.totalorder %v2883_v47, %v2725_v17  ;;  %v2265_v47 = vld [vmem:[%s3589_s1 + $0x1a0] sm:$0xff] }
  0xb4   :  { %v396_v60 = vadd.f32 %v395_v53, %v253_v33  ;;  %v1067_v33 = vmul.f32 %v923_v31, %v923_v31  ;;  %v1070_v53 = vmul.f32 %v926_v24, %v926_v24  ;;  %v1207_v11 = vadd.f32 %v1204_v22, %v1064_v13  ;;  %v2264_v13 = vld [vmem:[%s3589_s1 + $0xd8] sm:$0xff] }
  0xb5   :  { %v260_v31 = vmul.f32 %v116_v6, %v116_v6  ;;  %v938_v3 = vsel %vm650_vm9, %v2264_v13, 0.0  ;;  %v262_v22 = vmul.f32 %v3098_v0, %v3098_v0  ;;  %v960_v54 = vsel %vm3696_vm5, %v2515_v1, 0.0 }
  0xb6   :  { %v397_v8 = vadd.f32 %v396_v60, %v254_v32  ;;  %v1210_v60 = vadd.f32 %v1207_v11, %v1067_v33  ;;  %v941_v33 = vsel %vm653_vm10, %v2440_v25, 0.0  ;;  %v1082_v50 = vmul.f32 %v938_v3, %v938_v3  ;;  %v125_v3 = vld [vmem:[%s3589_s1 + $0x348] sm:$0xff] }
  0xb7   :  { %v1085_v11 = vmul.f32 %v941_v33, %v941_v33  ;;  %v947_v25 = vsel %vm3692_vm1, %v2466_v45, 0.0  ;;  %v123_v45 = vld [vmem:[%s3589_s1 + $0x338] sm:$0xff]  ;;  %v269_v55 = vmul.f32 %v125_v3, %v125_v3  ;;  %v966_v33 = vsel %vm3698_vm7, %v2539_v16, 0.0  ;;  %v129_v16 = vld [vmem:[%s3589_s1 + $0x368] sm:$0xff]  ;;  %v132_v3 = vld [vmem:[%s3589_s1 + $0x380] sm:$0xff] }
  0xb8   :  { %v398_v15 = vadd.f32 %v397_v8, %v255_v43  ;;  %v1073_v43 = vmul.f32 %v929_v62, %v929_v62  ;;  %v1213_v8 = vadd.f32 %v1210_v60, %v1070_v53  ;;  %v120_v62 = vld [vmem:[%s3589_s1 + $0x320] sm:$0xff]  ;;  %v1091_v60 = vmul.f32 %v947_v25, %v947_v25  ;;  %v3702_v25 = vld [vmem:[#allocation7_spill] sm:$0xff] }
  0xb9   :  { %v264_v6 = vmul.f32 %v120_v62, %v120_v62  ;;  %v128_v62 = vld [vmem:[%s3589_s1 + $0x360] sm:$0xff]  ;;  %vm3701_vm8 = vcmp.eq.s32.totalorder %v3700_v18, %v2897_v49 }
  0xba   :  { %v399_v32 = vadd.f32 %v398_v15, %v256_v61  ;;  %v1216_v15 = vadd.f32 %v1213_v8, %v1073_v43  ;;  %v1097_v8 = vmul.f32 %v953_v42, %v953_v42 }
  0xbc   :  { %v400_v19 = vadd.f32 %v399_v32, %v257_v56  ;;  %v1079_v56 = vmul.f32 %v935_v34, %v935_v34  ;;  %v1219_v36 = vadd.f32 %v1216_v15, %v1076_v28  ;;  %v263_v32 = vmul.f32 %v119_v29, %v119_v29 }
  0xbd   :  { %v1104_v15 = vmul.f32 %v960_v54, %v960_v54  ;;  %v3711_v54 = vld [vmem:[#allocation10_spill] sm:$0xff] }
  0xbe   :  { %v401_v61 = vadd.f32 %v400_v19, %v258_v21  ;;  %v944_v21 = vsel %vm3691_vm0, %v2453_v35, 0.0  ;;  %v1222_v37 = vadd.f32 %v1219_v36, %v1079_v56  ;;  %v122_v19 = vld [vmem:[%s3589_s1 + $0x330] sm:$0xff]  ;;  %v950_v35 = vsel %vm3693_vm2, %v2477_v48, 0.0 }
  0xbf   :  { %v1088_v63 = vmul.f32 %v944_v21, %v944_v21  ;;  %v266_v4 = vmul.f32 %v122_v19, %v122_v19  ;;  %v956_v48 = vsel %vm3695_vm4, %v2499_v57, 0.0  ;;  %v126_v57 = vld [vmem:[%s3589_s1 + $0x350] sm:$0xff]  ;;  %v963_v56 = vsel %vm3697_vm6, %v2265_v47, 0.0  ;;  %v3699_v21 = vld [vmem:[#allocation6_spill] sm:$0xff] }
  0xc0   :  { %v402_v24 = vadd.f32 %v401_v61, %v259_v27  ;;  %v1225_v27 = vadd.f32 %v1222_v37, %v1082_v50  ;;  %v267_v61 = vmul.f32 %v123_v45, %v123_v45  ;;  %v1107_v50 = vmul.f32 %v963_v56, %v963_v56  ;;  %v3714_v56 = vld [vmem:[#allocation14_spill] sm:$0xff] }
  0xc1   :  { %v1110_v37 = vmul.f32 %v966_v33, %v966_v33 }
  0xc2   :  { %v403_v20 = vadd.f32 %v402_v24, %v260_v31  ;;  %v1228_v39 = vadd.f32 %v1225_v27, %v1085_v11  ;;  %v1094_v31 = vmul.f32 %v950_v35, %v950_v35  ;;  %v1100_v24 = vmul.f32 %v956_v48, %v956_v48 }
  0xc4   :  { %v404_v53 = vadd.f32 %v403_v20, %v261_v9  ;;  %v1231_v44 = vadd.f32 %v1228_v39, %v1088_v63  ;;  %v272_v63 = vmul.f32 %v128_v62, %v128_v62  ;;  %v273_v39 = vmul.f32 %v129_v16, %v129_v16  ;;  %v3722_v16 = vld [vmem:[#allocation15_spill] sm:$0xff] }
  0xc5   :  { %vm3723_vm2 = vcmp.eq.s32.totalorder %v3722_v16, %v2897_v49 }
  0xc6   :  { %v405_v2 = vadd.f32 %v404_v53, %v262_v22  ;;  %v1234_v13 = vadd.f32 %v1231_v44, %v1091_v60  ;;  %v270_v22 = vmul.f32 %v126_v57, %v126_v57  ;;  %v271_v53 = vmul.f32 %v3149_v52, %v3149_v52  ;;  %v3709_v44 = vld [vmem:[#allocation27_spill] sm:$0xff] }
  0xc7   :  { %vm3710_vm11 = vcmp.eq.s32.totalorder %v3709_v44, %v2897_v49 }
  0xc8   :  { %v406_v43 = vadd.f32 %v405_v2, %v263_v32  ;;  %v1237_v17 = vadd.f32 %v1234_v13, %v1094_v31  ;;  %v969_v32 = vsel %vm3701_vm8, %v3699_v21, 0.0  ;;  %v3708_v31 = vld [vmem:[#allocation9_spill] sm:$0xff]  ;;  %v3720_v21 = vld [vmem:[#allocation31_spill] sm:$0xff] }
  0xc9   :  { %v1113_v19 = vmul.f32 %v969_v32, %v969_v32  ;;  %v978_v48 = vsel %vm3710_vm11, %v3708_v31, 0.0  ;;  %v277_v18 = vmul.f32 %v3720_v21, %v3720_v21  ;;  %v1024_v41 = vsel %vm3210_vm13, %v3720_v21, 0.0  ;;  %v149_v21 = vld [vmem:[%s3589_s1 + $0x408] sm:$0xff] }
  0xca   :  { %v407_v34 = vadd.f32 %v406_v43, %v264_v6  ;;  %v1240_v29 = vadd.f32 %v1237_v17, %v1097_v8  ;;  %v3703_v6 = vld [vmem:[#allocation25_spill] sm:$0xff]  ;;  %v3706_v43 = vld [vmem:[#allocation26_spill] sm:$0xff]  ;;  %v1122_v57 = vmul.f32 %v978_v48, %v978_v48  ;;  %vm17_vm13 = vcmask 0  }
  0xcb   :  { %vm3704_vm9 = vcmp.eq.s32.totalorder %v3703_v6, %v2897_v49  ;;  %vm3707_vm10 = vcmp.eq.s32.totalorder %v3706_v43, %v2897_v49 }
  0xcc   :  { %v408_v28 = vadd.f32 %v407_v34, %v265_v38  ;;  %v1243_v36 = vadd.f32 %v1240_v29, %v1100_v24  ;;  %v972_v2 = vsel %vm3704_vm9, %v3702_v25, 0.0  ;;  %v3705_v38 = vld [vmem:[#allocation8_spill] sm:$0xff] }
  0xcd   :  { %v975_v60 = vsel %vm3707_vm10, %v3705_v38, 0.0  ;;  %v1116_v42 = vmul.f32 %v972_v2, %v972_v2  ;;  %v131_v34 = vld [vmem:[%s3589_s1 + $0x378] sm:$0xff] }
  0xce   :  { %v409_v9 = vadd.f32 %v408_v28, %v266_v4  ;;  %v1247_v59 = vadd.f32 %v1243_v36, %v1104_v15  ;;  %v1119_v8 = vmul.f32 %v975_v60, %v975_v60  ;;  %v275_v24 = vmul.f32 %v131_v34, %v131_v34  ;;  %v3718_v36 = vld [vmem:[#allocation13_spill] sm:$0xff] }
  0xcf   :  { %v276_v15 = vmul.f32 %v132_v3, %v132_v3  ;;  %vm3719_vm1 = vcmp.eq.s32.totalorder %v3718_v36, %v2897_v49 }
  0xd0   :  { %v410_v1 = vadd.f32 %v409_v9, %v267_v61  ;;  %v1250_v35 = vadd.f32 %v1247_v59, %v1107_v50  ;;  %v274_v61 = vmul.f32 %v3167_v30, %v3167_v30  ;;  %v3717_v50 = vld [vmem:[#allocation19_spill] sm:$0xff]  ;;  %v3721_v59 = vld [vmem:[#allocation28_spill] sm:$0xff] }
  0xd1   :  { %v987_v62 = vsel %vm3719_vm1, %v3717_v50, 0.0  ;;  %v990_v25 = vsel %vm3723_vm2, %v3721_v59, 0.0 }
  0xd2   :  { %v411_v20 = vadd.f32 %v410_v1, %v268_v46  ;;  %v1253_v4 = vadd.f32 %v1250_v35, %v1110_v37  ;;  %v3712_v46 = vld [vmem:[#allocation11_spill] sm:$0xff]  ;;  %v135_v37 = vld [vmem:[%s3589_s1 + $0x398] sm:$0xff] }
  0xd3   :  { %vm3713_vm12 = vcmp.eq.s32.totalorder %v3712_v46, %v2897_v49  ;;  %v3724_v35 = vld [vmem:[#allocation16_spill] sm:$0xff]  ;;  %v279_v43 = vmul.f32 %v135_v37, %v135_v37 }
  0xd4   :  { %v412_v11 = vadd.f32 %v411_v20, %v269_v55  ;;  %v1256_v13 = vadd.f32 %v1253_v4, %v1113_v19  ;;  %v981_v9 = vsel %vm3713_vm12, %v3711_v54, 0.0  ;;  %v3715_v55 = vld [vmem:[#allocation12_spill] sm:$0xff]  ;;  %v136_v19 = vld [vmem:[%s3589_s1 + $0x3a0] sm:$0xff]  ;;  %vm3725_vm3 = vcmp.eq.s32.totalorder %v3724_v35, %v2897_v49 }
  0xd5   :  { %vm3716_vm0 = vcmp.eq.s32.totalorder %v3715_v55, %v2897_v49  ;;  %v1125_v33 = vmul.f32 %v981_v9, %v981_v9  ;;  %v134_v20 = vld [vmem:[%s3589_s1 + $0x390] sm:$0xff]  ;;  %v993_v38 = vsel %vm3725_vm3, %v3013_v58, 0.0  ;;  %v3726_v4 = vld [vmem:[#allocation29_spill] sm:$0xff]  ;;  %v280_v31 = vmul.f32 %v136_v19, %v136_v19  ;;  %v3732_v55 = vld [vmem:[#allocation18_spill] sm:$0xff] }
  0xd6   :  { %v413_v27 = vadd.f32 %v412_v11, %v270_v22  ;;  %v1259_v47 = vadd.f32 %v1256_v13, %v1116_v42  ;;  %v984_v1 = vsel %vm3716_vm0, %v3714_v56, 0.0  ;;  %v278_v6 = vmul.f32 %v134_v20, %v134_v20  ;;  %v137_v42 = vld [vmem:[%s3589_s1 + $0x3a8] sm:$0xff]  ;;  %v138_v58 = vld [vmem:[%s3589_s1 + $0x3b0] sm:$0xff]  ;;  %v3730_v9 = vld [vmem:[#allocation17_spill] sm:$0xff] }
  0xd7   :  { %vm3727_vm4 = vcmp.eq.s32.totalorder %v3726_v4, %v2897_v49  ;;  %v1137_v48 = vmul.f32 %v993_v38, %v993_v38  ;;  %v281_v13 = vmul.f32 %v137_v42, %v137_v42  ;;  %vm3731_vm6 = vcmp.eq.s32.totalorder %v3730_v9, %v2897_v49  ;;  %v3734_v20 = vld [vmem:[#allocation20_spill] sm:$0xff] }
  0xd8   :  { %v414_v45 = vadd.f32 %v413_v27, %v271_v53  ;;  %v1262_v22 = vadd.f32 %v1259_v47, %v1119_v8  ;;  %v1128_v53 = vmul.f32 %v984_v1, %v984_v1  ;;  %v996_v34 = vsel %vm3727_vm4, %v3029_v10, 0.0  ;;  %v139_v10 = vld [vmem:[%s3589_s1 + $0x3b8] sm:$0xff] }
  0xd9   :  { %v1140_v54 = vmul.f32 %v996_v34, %v996_v34  ;;  %vm3733_vm7 = vcmp.eq.s32.totalorder %v3732_v55, %v2897_v49  ;;  %vm3735_vm8 = vcmp.eq.s32.totalorder %v3734_v20, %v3124_v12  ;;  %v1018_v35 = vsel %vm730_vm14, %v3149_v52, 0.0  ;;  %v146_v52 = vld [vmem:[%s3589_s1 + $0x3f0] sm:$0xff]  ;;  %v152_v55 = vld [vmem:[%s3589_s1 + $0x420] sm:$0xff] }
  0xda   :  { %v415_v28 = vadd.f32 %v414_v45, %v272_v63  ;;  %v1265_v11 = vadd.f32 %v1262_v22, %v1122_v57  ;;  %v1131_v63 = vmul.f32 %v987_v62, %v987_v62  ;;  %v1005_v1 = vsel %vm3733_vm7, %v3080_v23, 0.0  ;;  %v3736_v23 = vld [vmem:[#allocation21_spill] sm:$0xff] }
  0xdb   :  { %v1009_v50 = vsel %vm3735_vm8, %v3098_v0, 0.0  ;;  %vm3737_vm9 = vcmp.eq.s32.totalorder %v3736_v23, %v3124_v12  ;;  %v143_v0 = vld [vmem:[%s3589_s1 + $0x3d8] sm:$0xff]  ;;  %v1162_v34 = vmul.f32 %v1018_v35, %v1018_v35 }
  0xdc   :  { %v416_v17 = vadd.f32 %v415_v28, %v273_v39  ;;  %v1268_v27 = vadd.f32 %v1265_v11, %v1125_v33  ;;  %v1134_v39 = vmul.f32 %v990_v25, %v990_v25  ;;  %v3728_v28 = vld [vmem:[#allocation30_spill] sm:$0xff]  ;;  %v1153_v59 = vmul.f32 %v1009_v50, %v1009_v50 }
  0xdd   :  { %vm3729_vm5 = vcmp.eq.s32.totalorder %v3728_v28, %v2897_v49  ;;  %v142_v49 = vld [vmem:[%s3589_s1 + $0x3d0] sm:$0xff]  ;;  %v3738_v25 = vld [vmem:[#allocation22_spill] sm:$0xff]  ;;  %v287_v38 = vmul.f32 %v143_v0, %v143_v0  ;;  %v1168_v28 = vmul.f32 %v1024_v41, %v1024_v41  ;;  %v2290_v41 = vmov 0.0  }
  0xde   :  { %v417_v29 = vadd.f32 %v416_v17, %v274_v61  ;;  %v1271_v45 = vadd.f32 %v1268_v27, %v1128_v53  ;;  %v999_v8 = vsel %vm3729_vm5, %v3045_v7, 0.0  ;;  %v282_v17 = vmul.f32 %v138_v58, %v138_v58  ;;  %v140_v7 = vld [vmem:[%s3589_s1 + $0x3c0] sm:$0xff]  ;;  %18 = vst.msk [vmem:[#allocation3] sm:$0x1] %vm17_vm13, %v2290_v41 }
  0xdf   :  { %v1143_v47 = vmul.f32 %v999_v8, %v999_v8  ;;  %v284_v36 = vmul.f32 %v140_v7, %v140_v7  ;;  %v1012_v53 = vsel %vm3737_vm9, %v3117_v14, 0.0  ;;  %vm3739_vm10 = vcmp.eq.s32.totalorder %v3738_v25, %v3124_v12  ;;  %v144_v14 = vld [vmem:[%s3589_s1 + $0x3e0] sm:$0xff]  ;;  %v147_v12 = vld [vmem:[%s3589_s1 + $0x3f8] sm:$0xff] }
  0xe0   :  { %v418_v32 = vadd.f32 %v417_v29, %v275_v24  ;;  %v1274_v61 = vadd.f32 %v1271_v45, %v1131_v63  ;;  %v1002_v24 = vsel %vm3731_vm6, %v3064_v5, 0.0  ;;  %v141_v5 = vld [vmem:[%s3589_s1 + $0x3c8] sm:$0xff]  ;;  %v1156_v27 = vmul.f32 %v1012_v53, %v1012_v53  ;;  %v159_v25 = vld [vmem:[%s3589_s1 + $0x458] sm:$0xff] }
  0xe1   :  { %v1146_v33 = vmul.f32 %v1002_v24, %v1002_v24  ;;  %v285_v11 = vmul.f32 %v141_v5, %v141_v5  ;;  %v1021_v45 = vsel %vm733_vm15, %v3167_v30, 0.0  ;;  %v288_v42 = vmul.f32 %v144_v14, %v144_v14  ;;  %v150_v24 = vld [vmem:[%s3589_s1 + $0x410] sm:$0xff]  ;;  %v157_v53 = vld [vmem:[%s3589_s1 + $0x448] sm:$0xff] }
  0xe2   :  { %v419_v2 = vadd.f32 %v418_v32, %v276_v15  ;;  %v1277_v46 = vadd.f32 %v1274_v61, %v1134_v39  ;;  %v283_v15 = vmul.f32 %v139_v10, %v139_v10  ;;  %v1165_v61 = vmul.f32 %v1021_v45, %v1021_v45  ;;  %v154_v5 = vld [vmem:[%s3589_s1 + $0x430] sm:$0xff]  ;;  %v161_v14 = vld [vmem:[%s3589_s1 + $0x468] sm:$0xff] }
  0xe3   :  { %v290_v30 = vmul.f32 %v146_v52, %v146_v52 }
  0xe4   :  { %v420_v60 = vadd.f32 %v419_v2, %v277_v18  ;;  %v1280_v56 = vadd.f32 %v1277_v46, %v1137_v48  ;;  %v1149_v18 = vmul.f32 %v1005_v1, %v1005_v1  ;;  %v286_v2 = vmul.f32 %v142_v49, %v142_v49 }
  0xe6   :  { %v421_v44 = vadd.f32 %v420_v60, %v278_v6  ;;  %v1283_v22 = vadd.f32 %v1280_v56, %v1140_v54  ;;  %v1015_v6 = vsel %vm3739_vm10, %v3133_v40, 0.0  ;;  %v145_v40 = vld [vmem:[%s3589_s1 + $0x3e8] sm:$0xff]  ;;  %v294_v56 = vmul.f32 %v150_v24, %v150_v24 }
  0xe7   :  { %v1159_v60 = vmul.f32 %v1015_v6, %v1015_v6 }
  0xe8   :  { %v422_v3 = vadd.f32 %v421_v44, %v279_v43  ;;  %v1286_v32 = vadd.f32 %v1283_v22, %v1143_v47  ;;  %v289_v44 = vmul.f32 %v145_v40, %v145_v40  ;;  %v151_v47 = vld [vmem:[%s3589_s1 + $0x418] sm:$0xff] }
  0xe9   :  { %v295_v1 = vmul.f32 %v151_v47, %v151_v47  ;;  %v163_v40 = vld [vmem:[%s3589_s1 + $0x478] sm:$0xff] }
  0xea   :  { %v423_v57 = vadd.f32 %v422_v3, %v280_v31  ;;  %v1289_v16 = vadd.f32 %v1286_v32, %v1146_v33  ;;  %v291_v3 = vmul.f32 %v147_v12, %v147_v12  ;;  %v296_v33 = vmul.f32 %v152_v55, %v152_v55  ;;  %v156_v32 = vld [vmem:[%s3589_s1 + $0x440] sm:$0xff] }
  0xec   :  { %v424_v29 = vadd.f32 %v423_v57, %v281_v13  ;;  %v1292_v19 = vadd.f32 %v1289_v16, %v1149_v18  ;;  %v148_v13 = vld [vmem:[%s3589_s1 + $0x400] sm:$0xff]  ;;  %v301_v16 = vmul.f32 %v157_v53, %v157_v53 }
  0xed   :  { %v292_v46 = vmul.f32 %v148_v13, %v148_v13 }
  0xee   :  { %v425_v62 = vadd.f32 %v424_v29, %v282_v17  ;;  %v1296_v39 = vadd.f32 %v1292_v19, %v1153_v59  ;;  %v293_v17 = vmul.f32 %v149_v21, %v149_v21  ;;  %v153_v29 = vld [vmem:[%s3589_s1 + $0x428] sm:$0xff]  ;;  %v158_v59 = vld [vmem:[%s3589_s1 + $0x450] sm:$0xff] }
  0xef   :  { %v297_v20 = vmul.f32 %v153_v29, %v153_v29  ;;  %v302_v6 = vmul.f32 %v158_v59, %v158_v59 }
  0xf0   :  { %v426_v37 = vadd.f32 %v425_v62, %v283_v15  ;;  %v1299_v31 = vadd.f32 %v1296_v39, %v1156_v27  ;;  %v298_v62 = vmul.f32 %v154_v5, %v154_v5  ;;  %v303_v27 = vmul.f32 %v159_v25, %v159_v25 }
  0xf2   :  { %v427_v63 = vadd.f32 %v426_v37, %v284_v36  ;;  %v1302_v58 = vadd.f32 %v1299_v31, %v1159_v60  ;;  %v155_v36 = vld [vmem:[%s3589_s1 + $0x438] sm:$0xff]  ;;  %v305_v60 = vmul.f32 %v161_v14, %v161_v14 }
  0xf3   :  { %v299_v49 = vmul.f32 %v155_v36, %v155_v36 }
  0xf4   :  { %v428_v43 = vadd.f32 %v427_v63, %v285_v11  ;;  %v1305_v8 = vadd.f32 %v1302_v58, %v1162_v34  ;;  %v300_v11 = vmul.f32 %v156_v32, %v156_v32  ;;  %v160_v63 = vld [vmem:[%s3589_s1 + $0x460] sm:$0xff] }
  0xf5   :  { %v304_v35 = vmul.f32 %v160_v63, %v160_v63 }
  0xf6   :  { %v429_v4 = vadd.f32 %v428_v43, %v286_v2  ;;  %v1308_v51 = vadd.f32 %v1305_v8, %v1165_v61  ;;  %v162_v43 = vld [vmem:[%s3589_s1 + $0x470] sm:$0xff] }
  0xf7   :  { %v306_v45 = vmul.f32 %v162_v43, %v162_v43 }
  0xf8   :  { %v430_v48 = vadd.f32 %v429_v4, %v287_v38  ;;  %v1311_v9 = vadd.f32 %v1308_v51, %v1168_v28  ;;  %v307_v4 = vmul.f32 %v163_v40, %v163_v40 }
  0xfa   :  { %v431_v26 = vadd.f32 %v430_v48, %v288_v42 }
  0xfc   :  { %v432_v54 = vadd.f32 %v431_v26, %v289_v44 }
  0xfe   :  { %v433_v10 = vadd.f32 %v432_v54, %v290_v30 }
 0x100   :  { %v434_v57 = vadd.f32 %v433_v10, %v291_v3 }
 0x102   :  { %v435_v7 = vadd.f32 %v434_v57, %v292_v46 }
 0x104   :  { %v436_v15 = vadd.f32 %v435_v7, %v293_v17 }
 0x106   :  { %v437_v22 = vadd.f32 %v436_v15, %v294_v56  ;;  %v460_v56 = vld [vmem:[#allocation3] sm:$0x1] }
 0x108   :  { %v438_v50 = vadd.f32 %v437_v22, %v295_v1 }
 0x10a   :  { %v439_v18 = vadd.f32 %v438_v50, %v296_v33 }
 0x10c   :  { %v440_v23 = vadd.f32 %v439_v18, %v297_v20 }
 0x10e   :  { %v441_v37 = vadd.f32 %v440_v23, %v298_v62 }
 0x110   :  { %v442_v0 = vadd.f32 %v441_v37, %v299_v49 }
 0x112   :  { %v443_v2 = vadd.f32 %v442_v0, %v300_v11 }
 0x114   :  { %v444_v19 = vadd.f32 %v443_v2, %v301_v16 }
 0x116   :  { %v445_v38 = vadd.f32 %v444_v19, %v302_v6 }
 0x118   :  { %v446_v39 = vadd.f32 %v445_v38, %v303_v27 }
 0x11a   :  { %v447_v42 = vadd.f32 %v446_v39, %v304_v35 }
 0x11c   :  { %v448_v34 = vadd.f32 %v447_v42, %v305_v60 }
 0x11e   :  { %v449_v31 = vadd.f32 %v448_v34, %v306_v45 }
 0x120   :  { %v450_v52 = vadd.f32 %v449_v31, %v307_v4 }
 0x122   :  { %451 = vadd.xlane.f32.xlu0 %v450_v52 }
 0x126   :  { %1342 = vadd.xlane.f32.xlu0 %v1311_v9 }
 0x134   :  { %v2072_v44 = vpop.xlane.xlu1 %2071 }
 0x135   :  { %v2073_v48 = vrot.slane %v2072_v44, 4 }
 0x137   :  { %v2074_v58 = vadd.f32 %v2073_v48, %v2072_v44 }
 0x139   :  { %v2075_v28 = vrot.slane %v2074_v58, 2 }
 0x13b   :  { %v2076_v51 = vadd.f32 %v2075_v28, %v2074_v58 }
 0x13d   :  { %v2077_v24 = vrot.slane %v2076_v51, 1 }
 0x13f   :  { %v2078_v47 = vadd.f32 %v2077_v24, %v2076_v51 }
 0x1af   :  { %v452_v61 = vpop.xlane.xlu0 %451 }
 0x1b0   :  { %v453_v12 = vrot.slane %v452_v61, 4 }
 0x1b2   :  { %v454_v30 = vadd.f32 %v453_v12, %v452_v61 }
 0x1b3   :  { %v1343_v26 = vpop.xlane.xlu0 %1342 }
 0x1b4   :  { %v455_v8 = vrot.slane %v454_v30, 2  ;;  %v1344_v13 = vrot.slane %v1343_v26, 4 }
 0x1b6   :  { %v456_v3 = vadd.f32 %v455_v8, %v454_v30  ;;  %v1345_v54 = vadd.f32 %v1344_v13, %v1343_v26 }
 0x1b8   :  { %v457_v21 = vrot.slane %v456_v3, 1  ;;  %v1346_v46 = vrot.slane %v1345_v54, 2 }
 0x1ba   :  { %v458_v10 = vadd.f32 %v457_v21, %v456_v3  ;;  %v1347_v9 = vadd.f32 %v1346_v46, %v1345_v54 }
 0x1bc   :  { %2247 = vpush %v458_v10  ;;  %v1348_v17 = vrot.slane %v1347_v9, 1 }
 0x1be   :  { %v1349_v57 = vadd.f32 %v1348_v17, %v1347_v9 }
 0x1c0   :  { %2249 = vpush %v1349_v57 }
 0x1c1   :  { %2251 = vpush %v2078_v47 }
 0x1ed   :  { %s2248_s18 = spop %2247 }
 0x1ee   :  { %s463_s19 = smul.f32 %s2248_s18, %s462_s17 }
 0x1f0   :  { %v464_v7 = vstv %s463_s19 }
 0x1f1   :  { %v465_v55 = vadd.f32 %v464_v7, %v460_v56  ;;  %s2250_s20 = spop %2249 }
 0x1f2   :  { %s2252_s21 = spop %2251  ;;  %s2084_s22 = smul.f32 %s2250_s20, %s462_s17 }
 0x1f3   :  { %467 = vst.msk [vmem:[#allocation3] sm:$0x1] %vm17_vm13, %v465_v55  ;;  %s2082_s23 = smul.f32 0.0033333334, %s2252_s21 }
 0x1f5   :  { %s2085_s24 = ssub.f32 %s2082_s23, %s2084_s22 }
 0x1f7   :  { %v2086_v15 = vstv %s2085_s24 }
 0x1fa   :  { %v2083_v1 = vld [vmem:[#allocation3] sm:$0x1] }
 0x1fb   :  { %v2087_v29 = vadd.f32 %v2086_v15, %v2083_v1 }
 0x1fd   :  { %2088 = vst.msk [vmem:[#allocation3] sm:$0x1] %vm17_vm13, %v2087_v29 }
 0x1fe   :  { %2277 = shalt.err (!%p2274_p4)
}
 0x1ff   :  { %s2278_s30 = scalar_lea.hbm %s3590_s2, 16 }
 0x200   :  { %p2279_p5 = scmp.ne.s32.totalorder %s3590_s2, %s2278_s30  ;;  %p2282_p6 = scmp.lt.u32.totalorder %s2278_s30, %s3590_s2 }
 0x202   :  { %p2284_p7 = pnand %p2282_p6, %p2279_p5 }
 0x204   :  { %2287 = shalt.err (!%p2284_p7)
}
 0x205   :  { %2098 = dma.vmem_to_hbm [thread:$0]  %s2096_s26, 16, %s3590_s2, [#allocation4]  }
 0x206   :  { %2288 = dma.done.wait [#allocation4], 16  }
 0x207   :  { %2289 = vsyncadd [#allocation4], 4294967280 }
 0x208   :  { %2102 = vsyncpa [#allocation4], 1 }

</bundles_post_ra>
